<compile_context>
chip_gen: v7x
topology: tpu7x:2x2x1
jax: 0.10.0
libtpu: 0.0.40
codegen_flags: <defaults>
</compile_context>

<pallas_src>
import jax
import jax.numpy as jnp
from jax.experimental import pallas as pl
from jax.experimental.pallas import tpu as pltpu

NUM_CLASSES = 10          # real classifier width
OUT_PAD = 128             # lane-dense padded classifier width
TB_MAX = 512              # batch tile (multiple of 256 -> good on v5e/v6e/v7x)


def _round_up(n, m):
    return ((n + m - 1) // m) * m


def mlp_kernel(x_ref, w1_ref, b1_ref, w2_ref, b2_ref, out_ref):
    # x: (TB, 784)           | w1: (784, 784) bf16 (in,out) | b1: (1, 784) f32
    # w2: (784, 128) bf16    | b2: (1, 128) f32             | out: (TB, 128)
    x = x_ref[...].astype(jnp.bfloat16)   # no-op if x already streamed as bf16

    # Layer 1: Linear(784, 784) + ReLU  (bf16 MXU matmul, f32 accumulation)
    h = jnp.dot(x, w1_ref[...], preferred_element_type=jnp.float32) + b1_ref[...]
    h = jnp.maximum(h, 0.0)

    # Layer 2: Linear(784, 10) padded to 128 output lanes
    logits = jnp.dot(h.astype(jnp.bfloat16), w2_ref[...],
                     preferred_element_type=jnp.float32) + b2_ref[...]

    # Mask padded logit columns (finite large-negative, NOT -inf, to avoid NaNs).
    col = jax.lax.broadcasted_iota(jnp.int32, logits.shape, 1)
    logits = jnp.where(col < NUM_CLASSES, logits, -1e30)

    # log_softmax along dim=1 (numerically stable), f32 on the VPU.
    m = jnp.max(logits, axis=1, keepdims=True)
    shifted = logits - m
    lse = jnp.log(jnp.sum(jnp.exp(shifted), axis=1, keepdims=True))
    out_ref[...] = (shifted - lse).astype(out_ref.dtype)


def prepare_params(w1, b1, w2, b2):
    """One-time conversion from PyTorch (out,in) layout to kernel layout.

    Returns bf16 (in,out) weights (classifier padded to OUT_PAD columns) and
    f32 row-vector biases. Do this once at init, NOT per forward call.
    """
    w1_t = jnp.asarray(w1, jnp.float32).T.astype(jnp.bfloat16)          # (784, 784)
    b1_r = jnp.asarray(b1, jnp.float32).reshape(1, -1)                  # (1, 784)

    in_dim = w2.shape[1]
    w2_t = jnp.zeros((in_dim, OUT_PAD), jnp.bfloat16)
    w2_t = w2_t.at[:, :NUM_CLASSES].set(
        jnp.asarray(w2, jnp.float32).T.astype(jnp.bfloat16))            # (784, 128)
    b2_r = jnp.zeros((1, OUT_PAD), jnp.float32)
    b2_r = b2_r.at[0, :NUM_CLASSES].set(jnp.asarray(b2, jnp.float32))   # (1, 128)
    return w1_t, b1_r, w2_t, b2_r


def _choose_tile(B):
    """Batch tile: big tiles for large B, >=2 tiles for mid-size B (v7x megacore),
    16-row alignment (full bf16 sublane packing) for small B."""
    if B >= 2 * TB_MAX:
        return TB_MAX
    # Split into ~2 tiles so the "parallel" batch axis feeds both v7x TCs.
    return min(TB_MAX, _round_up(-(-B // 2), 16))


def net_forward(x, w1_t, b1_r, w2_t, b2_r, out_dtype=jnp.float32):
    """x: (B, 784) f32 or bf16. Params from prepare_params. -> (B, 10) out_dtype.

    TODO(synk): for large-batch pipelines, deliver x already in bf16 upstream
    (an extra per-call wrapper cast here would just add an HBM pass).
    """
    B, in_dim = x.shape
    hid = w1_t.shape[1]
    out_pad = w2_t.shape[1]

    tb = _choose_tile(B)
    b_pad = _round_up(B, tb)
    if b_pad != B:
        x = jnp.pad(x, ((0, b_pad - B), (0, 0)))
    grid = (b_pad // tb,)

    x_bytes = b_pad * in_dim * x.dtype.itemsize
    w_bytes = w1_t.size * 2 + w2_t.size * 2 + (hid + out_pad) * 4
    o_bytes = b_pad * out_pad * jnp.dtype(out_dtype).itemsize
    cost = pl.CostEstimate(
        flops=2 * b_pad * in_dim * (hid + out_pad),
        transcendentals=b_pad * out_pad,           # exp in log-softmax
        bytes_accessed=x_bytes + w_bytes + o_bytes,
    )

    out = pl.pallas_call(
        mlp_kernel,
        out_shape=jax.ShapeDtypeStruct((b_pad, out_pad), out_dtype),
        grid=grid,
        in_specs=[
            pl.BlockSpec((tb, in_dim), lambda i: (i, 0)),      # x: streamed per tile
            pl.BlockSpec((in_dim, hid), lambda i: (0, 0)),     # W1: resident
            pl.BlockSpec((1, hid), lambda i: (0, 0)),          # b1: resident
            pl.BlockSpec((hid, out_pad), lambda i: (0, 0)),    # W2: resident
            pl.BlockSpec((1, out_pad), lambda i: (0, 0)),      # b2: resident
        ],
        out_specs=pl.BlockSpec((tb, out_pad), lambda i: (i, 0)),
        compiler_params=pltpu.CompilerParams(
            dimension_semantics=("parallel",),                 # megacore sharding
            vmem_limit_bytes=32 * 1024 * 1024,                 # v5e default is 16 MiB
        ),
        cost_estimate=cost,
    )(x, w1_t, b1_r, w2_t, b2_r)

    return out[:B, :NUM_CLASSES]


def init_params(key):
    """Deterministic PyTorch-Linear-style init: U(-1/sqrt(fan_in), 1/sqrt(fan_in))."""
    k1, k2, k3, k4 = jax.random.split(key, 4)
    bound = 1.0 / jnp.sqrt(784.0)
    w1 = jax.random.uniform(k1, (784, 784), jnp.float32, -bound, bound)
    b1 = jax.random.uniform(k2, (784,), jnp.float32, -bound, bound)
    w2 = jax.random.uniform(k3, (NUM_CLASSES, 784), jnp.float32, -bound, bound)
    b2 = jax.random.uniform(k4, (NUM_CLASSES,), jnp.float32, -bound, bound)
    return w1, b1, w2, b2


def reference_forward(x, w1, b1, w2, b2):
    """Pure-JAX reference mirroring the kernel's bf16-matmul / f32-accum strategy."""
    h = jnp.dot(x.astype(jnp.bfloat16), w1.T.astype(jnp.bfloat16),
                preferred_element_type=jnp.float32) + b1
    h = jnp.maximum(h, 0.0)
    logits = jnp.dot(h.astype(jnp.bfloat16), w2.T.astype(jnp.bfloat16),
                     preferred_element_type=jnp.float32) + b2
    return jax.nn.log_softmax(logits, axis=1)


if __name__ == "__main__":
    key = jax.random.PRNGKey(0)
    kx, kp = jax.random.split(key)

    w1, b1, w2, b2 = init_params(kp)
    # One-time parameter preparation (transpose + pad + bf16 cast).
    w1_t, b1_r, w2_t, b2_r = prepare_params(w1, b1, w2, b2)

    # --- Small batch (single tile, latency path) ---------------------------
    B = 8
    x = jax.random.normal(kx, (B, 784), jnp.float32)
    out = jax.block_until_ready(net_forward(x, w1_t, b1_r, w2_t, b2_r))
    ref = reference_forward(x, w1, b1, w2, b2)
    assert out.shape == (B, NUM_CLASSES)
    assert jnp.allclose(out, ref, atol=2e-3, rtol=2e-3), "mismatch vs bf16 reference"

    ref_f32 = jax.nn.log_softmax(
        jnp.maximum(x @ w1.T + b1, 0.0) @ w2.T + b2, axis=1)
    assert jnp.allclose(out, ref_f32, atol=5e-2, rtol=5e-2), "mismatch vs f32 reference"

    # --- Mid-size batch (grid >= 2, padded batch rows, bf16 output path) ---
    B2 = 40
    x2 = jax.random.normal(jax.random.fold_in(kx, 1), (B2, 784), jnp.float32)
    out2 = jax.block_until_ready(
        net_forward(x2.astype(jnp.bfloat16), w1_t, b1_r, w2_t, b2_r,
                    out_dtype=jnp.bfloat16))
    ref2 = reference_forward(x2, w1, b1, w2, b2)
    assert out2.shape == (B2, NUM_CLASSES)
    assert jnp.allclose(out2.astype(jnp.float32), ref2, atol=1e-1, rtol=1e-1), \
        "mismatch on multi-tile bf16 path"

    # TODO(synk): the PyTorch module also stashes intermediate activations in
    # self.zs with retain_grad() for later gradient inspection; that is a
    # training-time autograd bookkeeping detail with no forward-pass Pallas
    # equivalent.

    print("KERNEL_OK")
</pallas_src>

<mosaic_0001>
module attributes {stable_mosaic.version = 11 : i64} {
  func.func @mlp_kernel(%arg0: i32, %arg1: memref<16x784xf32, #tpu.memory_space<vmem>>, %arg2: memref<784x784xbf16, #tpu.memory_space<vmem>>, %arg3: memref<1x784xf32, #tpu.memory_space<vmem>>, %arg4: memref<784x128xbf16, #tpu.memory_space<vmem>>, %arg5: memref<1x128xf32, #tpu.memory_space<vmem>>, %arg6: memref<16x128xf32, #tpu.memory_space<vmem>>) attributes {dimension_semantics = [#tpu.dimension_semantics<parallel>], iteration_bounds = array<i64: 1>, scalar_prefetch = 0 : i64, scratch_operands = 0 : i64, tpu.core_type = #tpu.core_type<tc>, window_params = [{transform_indices = @transform_0, window_bounds = array<i64: 16, 784>}, {pipeline_mode = #tpu.pipeline_mode<synchronous>, transform_indices = @transform_1, window_bounds = array<i64: 784, 784>}, {pipeline_mode = #tpu.pipeline_mode<synchronous>, transform_indices = @transform_2, window_bounds = array<i64: 1, 784>}, {pipeline_mode = #tpu.pipeline_mode<synchronous>, transform_indices = @transform_3, window_bounds = array<i64: 784, 128>}, {pipeline_mode = #tpu.pipeline_mode<synchronous>, transform_indices = @transform_4, window_bounds = array<i64: 1, 128>}, {transform_indices = @transform_5, window_bounds = array<i64: 16, 128>}]} {
    %c0 = arith.constant 0 : index
    %c0_0 = arith.constant 0 : index
    %0 = vector.load %arg1[%c0, %c0_0] : memref<16x784xf32, #tpu.memory_space<vmem>>, vector<16x784xf32>
    %1 = arith.truncf %0 : vector<16x784xf32> to vector<16x784xbf16>
    %c0_1 = arith.constant 0 : index
    %c0_2 = arith.constant 0 : index
    %2 = vector.load %arg2[%c0_1, %c0_2] : memref<784x784xbf16, #tpu.memory_space<vmem>>, vector<784x784xbf16>
    %cst = arith.constant dense<0.000000e+00> : vector<16x784xf32>
    %3 = tpu.matmul %1, %2, %cst {dimension_numbers = #tpu.dot_dimension_numbers<[1], [0], [0], [1], [0, 0, 1, 1], [], []>} : vector<16x784xbf16>, vector<784x784xbf16>, vector<16x784xf32> -> vector<16x784xf32>
    %c0_3 = arith.constant 0 : index
    %c0_4 = arith.constant 0 : index
    %4 = vector.load %arg3[%c0_3, %c0_4] : memref<1x784xf32, #tpu.memory_space<vmem>>, vector<1x784xf32>
    %5 = vector.broadcast %4 : vector<1x784xf32> to vector<16x784xf32>
    %6 = arith.addf %3, %5 : vector<16x784xf32>
    %cst_5 = arith.constant 0.000000e+00 : f32
    %7 = vector.broadcast %cst_5 : f32 to vector<16x784xf32>
    %8 = arith.maximumf %6, %7 : vector<16x784xf32>
    %9 = arith.truncf %8 : vector<16x784xf32> to vector<16x784xbf16>
    %c0_6 = arith.constant 0 : index
    %c0_7 = arith.constant 0 : index
    %10 = vector.load %arg4[%c0_6, %c0_7] : memref<784x128xbf16, #tpu.memory_space<vmem>>, vector<784x128xbf16>
    %cst_8 = arith.constant dense<0.000000e+00> : vector<16x128xf32>
    %11 = tpu.matmul %9, %10, %cst_8 {dimension_numbers = #tpu.dot_dimension_numbers<[1], [0], [0], [1], [0, 0, 1, 1], [], []>} : vector<16x784xbf16>, vector<784x128xbf16>, vector<16x128xf32> -> vector<16x128xf32>
    %c0_9 = arith.constant 0 : index
    %c0_10 = arith.constant 0 : index
    %12 = vector.load %arg5[%c0_9, %c0_10] : memref<1x128xf32, #tpu.memory_space<vmem>>, vector<1x128xf32>
    %13 = vector.broadcast %12 : vector<1x128xf32> to vector<16x128xf32>
    %14 = arith.addf %11, %13 : vector<16x128xf32>
    %15 = tpu.iota {dimensions = array<i32: 1>} : vector<16x128xi32>
    %c10_i32 = arith.constant 10 : i32
    %16 = vector.broadcast %c10_i32 : i32 to vector<16x128xi32>
    %17 = arith.cmpi slt, %15, %16 : vector<16x128xi32>
    %cst_11 = arith.constant -1.000000e+30 : f32
    %18 = vector.broadcast %cst_11 : f32 to vector<16x128xf32>
    %19 = arith.select %17, %14, %18 : vector<16x128xi1>, vector<16x128xf32>
    %cst_12 = arith.constant dense<0xFF800000> : vector<16xf32>
    %20 = vector.multi_reduction <maximumf>, %19, %cst_12 [1] : vector<16x128xf32> to vector<16xf32>
    %21 = vector.shape_cast %20 : vector<16xf32> to vector<16x1xf32>
    %22 = vector.broadcast %21 : vector<16x1xf32> to vector<16x128xf32>
    %23 = arith.subf %19, %22 : vector<16x128xf32>
    %24 = math.exp %23 : vector<16x128xf32>
    %cst_13 = arith.constant dense<0.000000e+00> : vector<16xf32>
    %25 = vector.multi_reduction <add>, %24, %cst_13 [1] : vector<16x128xf32> to vector<16xf32>
    %26 = vector.shape_cast %25 : vector<16xf32> to vector<16x1xf32>
    %27 = math.log %26 : vector<16x1xf32>
    %28 = vector.broadcast %27 : vector<16x1xf32> to vector<16x128xf32>
    %29 = arith.subf %23, %28 : vector<16x128xf32>
    %c0_14 = arith.constant 0 : index
    %c0_15 = arith.constant 0 : index
    %30 = vector.load %arg6[%c0_14, %c0_15] : memref<16x128xf32, #tpu.memory_space<vmem>>, vector<16x128xf32>
    tpu.vector_store %arg6[%c0_14, %c0_15], %29 {strides = array<i32>} : memref<16x128xf32, #tpu.memory_space<vmem>>, vector<16x128xf32>,
    return
  }
  func.func @transform_0(%arg0: i32) -> (i32, i32) {
    %c0_i32 = arith.constant 0 : i32
    %c0_i32_0 = arith.constant 0 : i32
    return %arg0, %c0_i32 : i32, i32
  }
  func.func @transform_1(%arg0: i32) -> (i32, i32) {
    %c0_i32 = arith.constant 0 : i32
    %c0_i32_0 = arith.constant 0 : i32
    %c0_i32_1 = arith.constant 0 : i32
    return %c0_i32, %c0_i32_0 : i32, i32
  }
  func.func @transform_2(%arg0: i32) -> (i32, i32) {
    %c0_i32 = arith.constant 0 : i32
    %c0_i32_0 = arith.constant 0 : i32
    %c0_i32_1 = arith.constant 0 : i32
    return %c0_i32, %c0_i32_0 : i32, i32
  }
  func.func @transform_3(%arg0: i32) -> (i32, i32) {
    %c0_i32 = arith.constant 0 : i32
    %c0_i32_0 = arith.constant 0 : i32
    %c0_i32_1 = arith.constant 0 : i32
    return %c0_i32, %c0_i32_0 : i32, i32
  }
  func.func @transform_4(%arg0: i32) -> (i32, i32) {
    %c0_i32 = arith.constant 0 : i32
    %c0_i32_0 = arith.constant 0 : i32
    %c0_i32_1 = arith.constant 0 : i32
    return %c0_i32, %c0_i32_0 : i32, i32
  }
  func.func @transform_5(%arg0: i32) -> (i32, i32) {
    %c0_i32 = arith.constant 0 : i32
    %c0_i32_0 = arith.constant 0 : i32
    return %arg0, %c0_i32 : i32, i32
  }
}

</mosaic_0001>

<bundles_post_ra>
// kernel: tpu_custom_call.1
= control target key start
LH: loop header
LB: loop body
LE: loop exit
PB: predicated region body
PF: predicated region fallthrough
CT: control target
= control target key end

     0   :  { %10 = vsyncpa [#allocation3], 0  ;;  %s5122_s0 = inlined_call_operand.hbm [shape: f32[16,784], index: 0, kind: input, shape index: {}]   ;;  %s5123_s1 = inlined_call_operand.hbm [shape: bf16[784,784], index: 1, kind: input, shape index: {}]   ;;  %s5124_s2 = inlined_call_operand.hbm [shape: f32[1,784], index: 2, kind: input, shape index: {}]   ;;  %s5125_s3 = inlined_call_operand.hbm [shape: bf16[784,128], index: 3, kind: input, shape index: {}]   ;;  %s5126_s4 = inlined_call_operand.hbm [shape: f32[1,128], index: 4, kind: input, shape index: {}]   ;;  %s5127_s5 = inlined_call_operand.hbm [shape: f32[16,128], index: 5, kind: output, shape index: {}]  }
   0x1   :  { %11 = vsyncpa [#allocation6], 0 }
   0x2   :  { %12 = vsyncpa [#allocation9], 0 }
   0x3   :  { %13 = vsyncpa [#allocation4], 0  ;;  %s4915_s18 = smov [#allocation5]   ;;  %s4775_s22 = scalar_lea.hbm %s5123_s1, 43904 }
   0x4   :  { %s31_s19 = sshll.u32 %s4915_s18, 4  ;;  %p4776_p0 = scmp.ne.s32.totalorder %s5123_s1, %s4775_s22  ;;  %s32_s19 = int_to_ptr.vmem [resolvable:$true] %s31_s19 }
   0x5   :  { %p4779_p1 = scmp.lt.u32.totalorder %s4775_s22, %s5123_s1 }
   0x7   :  { %p4781_p2 = pnand %p4779_p1, %p4776_p0 }
   0x9   :  { %4784 = shalt.err (!%p4781_p2)
}
   0xa   :  { %s4785_s27 = scalar_lea.vmem %s32_s19, 43904  ;;  %p4790_p4 = scmp.lt.s32.totalorder %s32_s19, %s32_s19 }
   0xb   :  { %p4786_p3 = scmp.ne.s32.totalorder %s32_s19, %s4785_s27  ;;  %p4791_p5 = scmp.lt.s32.totalorder %s4785_s27, %s4785_s27 }
   0xd   :  { %p4792_p6 = por %p4791_p5, %p4790_p4 }
   0xf   :  { %p4793_p7 = pnand %p4792_p6, %p4786_p3 }
  0x11   :  { %4796 = shalt.err (!%p4793_p7)
}
  0x12   :  { %s4916_s28 = smov 448   ;;  %s4917_s29 = smov 28  }
  0x13   :  { %37 = dma.hbm_to_vmem [thread:$0]  %s5123_s1, 43904, %s32_s19, [#allocation6], %s4916_s28, %s4916_s28, %s4917_s29  }
  0x14   :  { %s4918_s7 = smov [#allocation8]   ;;  %s4797_s11 = scalar_lea.hbm %s5125_s3, 6272 }
  0x15   :  { %s53_s8 = sshll.u32 %s4918_s7, 4  ;;  %p4798_p8 = scmp.ne.s32.totalorder %s5125_s3, %s4797_s11  ;;  %s54_s8 = int_to_ptr.vmem [resolvable:$true] %s53_s8 }
  0x16   :  { %p4801_p9 = scmp.lt.u32.totalorder %s4797_s11, %s5125_s3 }
  0x18   :  { %p4803_p10 = pnand %p4801_p9, %p4798_p8 }
  0x1a   :  { %4806 = shalt.err (!%p4803_p10)
}
  0x1b   :  { %s4807_s16 = scalar_lea.vmem %s54_s8, 6272  ;;  %p4812_p12 = scmp.lt.s32.totalorder %s54_s8, %s54_s8 }
  0x1c   :  { %p4808_p11 = scmp.ne.s32.totalorder %s54_s8, %s4807_s16  ;;  %p4813_p13 = scmp.lt.s32.totalorder %s4807_s16, %s4807_s16 }
  0x1e   :  { %p4814_p0 = por %p4813_p13, %p4812_p12 }
  0x20   :  { %p4815_p1 = pnand %p4814_p0, %p4808_p11 }
  0x22   :  { %4818 = shalt.err (!%p4815_p1)
}
  0x23   :  { %s4919_s1 = smov 64   ;;  %s4920_s17 = smov 4  }
  0x24   :  { %59 = dma.hbm_to_vmem [thread:$0]  %s5125_s3, 6272, %s54_s8, [#allocation9], %s4919_s1, %s4919_s1, %s4920_s17  }
  0x25   :  { %s4921_s20 = smov [#allocation2]   ;;  %s4819_s24 = scalar_lea.hbm %s5122_s0, 1792 }
  0x26   :  { %s19_s21 = sshll.u32 %s4921_s20, 4  ;;  %p4820_p2 = scmp.ne.s32.totalorder %s5122_s0, %s4819_s24  ;;  %s20_s21 = int_to_ptr.vmem [resolvable:$true] %s19_s21 }
  0x27   :  { %p4823_p3 = scmp.lt.u32.totalorder %s4819_s24, %s5122_s0 }
  0x29   :  { %p4825_p4 = pnand %p4823_p3, %p4820_p2 }
  0x2b   :  { %4828 = shalt.err (!%p4825_p4)
}
  0x2c   :  { %s4829_s29 = scalar_lea.vmem %s20_s21, 1792  ;;  %p4834_p6 = scmp.lt.s32.totalorder %s20_s21, %s20_s21 }
  0x2d   :  { %p4830_p5 = scmp.ne.s32.totalorder %s20_s21, %s4829_s29  ;;  %p4835_p7 = scmp.lt.s32.totalorder %s4829_s29, %s4829_s29 }
  0x2f   :  { %p4836_p8 = por %p4835_p7, %p4834_p6 }
  0x31   :  { %p4837_p9 = pnand %p4836_p8, %p4830_p5 }
  0x33   :  { %4840 = shalt.err (!%p4837_p9)
}
  0x34   :  { %s4922_s3 = smov 896   ;;  %s4923_s30 = smov 56  }
  0x35   :  { %25 = dma.hbm_to_vmem [thread:$0]  %s5122_s0, 1792, %s20_s21, [#allocation3], %s4922_s3, %s4922_s3, %s4923_s30  }
  0x36   :  { %s4924_s8 = smov [#allocation7]   ;;  %s4925_s10 = smov [#allocation10]  }
  0x37   :  { %s44_s9 = sshll.u32 %s4924_s8, 4  ;;  %s66_s11 = sshll.u32 %s4925_s10, 4  ;;  %s45_s9 = int_to_ptr.vmem [resolvable:$true] %s44_s9  ;;  %s67_s11 = int_to_ptr.vmem [resolvable:$true] %s66_s11 }
  0x38   :  { %s4841_s14 = scalar_lea.hbm %s5124_s2, 112 }
  0x39   :  { %p4842_p10 = scmp.ne.s32.totalorder %s5124_s2, %s4841_s14  ;;  %p4845_p11 = scmp.lt.u32.totalorder %s4841_s14, %s5124_s2 }
  0x3b   :  { %p4847_p12 = pnand %p4845_p11, %p4842_p10 }
  0x3d   :  { %4850 = shalt.err (!%p4847_p12)
}
  0x3e   :  { %s4851_s0 = scalar_lea.vmem %s45_s9, 112  ;;  %s4855_s18 = scalar_lea.vmem %s45_s9, 128 }
  0x3f   :  { %p4852_p13 = scmp.ne.s32.totalorder %s45_s9, %s4851_s0  ;;  %p4856_p0 = scmp.lt.s32.totalorder %s45_s9, %s45_s9 }
  0x40   :  { %p4857_p1 = scmp.lt.s32.totalorder %s4855_s18, %s4851_s0 }
  0x42   :  { %p4858_p2 = por %p4857_p1, %p4856_p0 }
  0x44   :  { %p4859_p3 = pnand %p4858_p2, %p4852_p13 }
  0x46   :  { %4862 = shalt.err (!%p4859_p3)
}
  0x47   :  { %47 = dma.hbm_to_vmem [thread:$0]  %s5124_s2, 112, %s45_s9, [#allocation6]  }
  0x48   :  { %s4863_s23 = scalar_lea.hbm %s5126_s4, 16 }
  0x49   :  { %p4864_p4 = scmp.ne.s32.totalorder %s5126_s4, %s4863_s23  ;;  %p4867_p5 = scmp.lt.u32.totalorder %s4863_s23, %s5126_s4 }
  0x4b   :  { %p4869_p6 = pnand %p4867_p5, %p4864_p4 }
  0x4d   :  { %4872 = shalt.err (!%p4869_p6)
}
  0x4e   :  { %s4873_s28 = scalar_lea.vmem %s67_s11, 16  ;;  %s4877_s29 = scalar_lea.vmem %s67_s11, 32 }
  0x4f   :  { %p4874_p7 = scmp.ne.s32.totalorder %s67_s11, %s4873_s28  ;;  %p4878_p8 = scmp.lt.s32.totalorder %s67_s11, %s67_s11 }
  0x50   :  { %p4879_p9 = scmp.lt.s32.totalorder %s4877_s29, %s4873_s28 }
  0x52   :  { %p4880_p10 = por %p4879_p9, %p4878_p8 }
  0x54   :  { %p4881_p11 = pnand %p4880_p10, %p4874_p7 }
  0x56   :  { %4884 = shalt.err (!%p4881_p11)
}
  0x57   :  { %69 = dma.hbm_to_vmem [thread:$0]  %s5126_s4, 16, %s67_s11, [#allocation9]  }
  0x58   :  { %4907 = dma.done.wait [#allocation3], 1792  }
  0x59   :  { %4908 = vsyncadd [#allocation3], 4294965504 }
  0x5a   :  { %4909 = dma.done.wait [#allocation6], 44016  }
  0x5b   :  { %4910 = vsyncadd [#allocation6], 4294923280 }
  0x5c   :  { %4911 = dma.done.wait [#allocation9], 6288  }
  0x5d   :  { %4912 = vsyncadd [#allocation9], 4294961008  ;;  %v4926_v0 = vmov 0   ;;  %v4228_v1 = vld [vmem:[#allocation5 + $0x4] ss:$28 sps:$4 sm:$0xff]   ;;  %v99_v10 = vld [vmem:[#allocation2 + $0x68] sm:$0xff] }
  0x5e   :  { %2465 = vmatprep.mubr.bf16.mxu1 %v4926_v0  ;;  %v4230_v2 = vld [vmem:[#allocation5 + $0xa84] ss:$28 sps:$4 sm:$0xff]   ;;  %2304 = vmatprep.subr.bf16.mxu0 %v4228_v1  ;;  %v4234_v5 = vld [vmem:[#allocation5 + $0x3c] ss:$28 sps:$4 sm:$0xff]   ;;  %v4238_v7 = vld [vmem:[#allocation5 + $0xc] ss:$28 sps:$4 sm:$0xff]  }
  0x5f   :  { %v4232_v3 = vld [vmem:[#allocation5] ss:$28 sps:$4 sm:$0xff]   ;;  %2433 = vmatprep.subr.bf16.mxu1 %v4230_v2  ;;  %v4236_v6 = vld [vmem:[#allocation5 + $0x8] ss:$28 sps:$4 sm:$0xff]   ;;  %v4239_v8 = vld [vmem:[#allocation5 + $0x38] ss:$28 sps:$4 sm:$0xff]  }
  0x60   :  { %v4233_v4 = vld [vmem:[#allocation5 + $0xa80] ss:$28 sps:$4 sm:$0xff]   ;;  %2305 = vmatpush1.bf16.msra.mxu0 %v4232_v3  ;;  %vm2300_vm0 = vcmask 130048   ;;  %v4240_v12 = vld [vmem:[#allocation5 + $0x74] ss:$28 sps:$4 sm:$0xff]   ;;  %vm4928_vm1 = vmmov 0  }
  0x61   :  { %2434 = vmatpush1.bf16.msra.mxu1 %v4233_v4  ;;  %2306 = vmatprep.subr.bf16.mxu0 %v4234_v5  ;;  %v92_v9 = vld [vmem:[#allocation2 + $0x30] sm:$0xff]  ;;  %v4245_v15 = vld [vmem:[#allocation5 + $0x70] ss:$28 sps:$4 sm:$0xff]   ;;  %v4250_v17 = vld [vmem:[#allocation5 + $0x7c] ss:$28 sps:$4 sm:$0xff]   ;;  %s4929_s4 = smov [#allocation11]  }
  0x62   :  { %2476 = vmatprep.subr.bf16.mxu1 %v4238_v7  ;;  %v5023_v11 = vpack.c.bf16 %v99_v10, %v92_v9  ;;  %v4242_v13 = vld [vmem:[#allocation5 + $0x40] ss:$28 sps:$4 sm:$0xff]   ;;  %v4246_v16 = vld [vmem:[#allocation5 + $0xac] ss:$28 sps:$4 sm:$0xff]   ;;  %v4248_v19 = vld [vmem:[#allocation5 + $0x78] ss:$28 sps:$4 sm:$0xff]  }
  0x63   :  { %v4244_v14 = vld [vmem:[#allocation5 + $0x44] ss:$28 sps:$4 sm:$0xff]   ;;  %v4256_v21 = vld [vmem:[#allocation5 + $0xb4] ss:$28 sps:$4 sm:$0xff]   ;;  %v4258_v24 = vld [vmem:[#allocation5 + $0x11c] ss:$28 sps:$4 sm:$0xff]  }
  0x64   :  { %2307 = vmatpush1.bf16.msra.mxu0 %v4239_v8  ;;  %3960 = vmatmul.mubr.msk.bf16.vlgmr.msra.gmra.mrb[0].mxu1 %vm2300_vm0, %v5023_v11  ;;  %v4251_v18 = vld [vmem:[#allocation5 + $0xa8] ss:$28 sps:$4 sm:$0xff]   ;;  %v4254_v22 = vld [vmem:[#allocation5 + $0xb0] ss:$28 sps:$4 sm:$0xff]   ;;  %v4257_v23 = vld [vmem:[#allocation5 + $0xe0] ss:$28 sps:$4 sm:$0xff]  }
  0x65   :  { %2477 = vmatpush1.bf16.msra.mxu1 %v4236_v6  ;;  %2308 = vmatprep.subr.bf16.mxu0 %v4240_v12  ;;  %v4252_v20 = vld [vmem:[#allocation5 + $0xe4] ss:$28 sps:$4 sm:$0xff]   ;;  %v4262_v25 = vld [vmem:[#allocation5 + $0xec] ss:$28 sps:$4 sm:$0xff]   ;;  %v4263_v26 = vld [vmem:[#allocation5 + $0x118] ss:$28 sps:$4 sm:$0xff]  }
  0x66   :  { %2478 = vmatprep.subr.bf16.mxu1 %v4244_v14  ;;  %v4260_v27 = vld [vmem:[#allocation5 + $0xe8] ss:$28 sps:$4 sm:$0xff]   ;;  %v4264_v28 = vld [vmem:[#allocation5 + $0x154] ss:$28 sps:$4 sm:$0xff]   ;;  %v4266_v30 = vld [vmem:[#allocation5 + $0x120] ss:$28 sps:$4 sm:$0xff]  }
  0x67   :  { %v4268_v29 = vld [vmem:[#allocation5 + $0x124] ss:$28 sps:$4 sm:$0xff]   ;;  %v4269_v31 = vld [vmem:[#allocation5 + $0x150] ss:$28 sps:$4 sm:$0xff]   ;;  %v4274_v33 = vld [vmem:[#allocation5 + $0x15c] ss:$28 sps:$4 sm:$0xff]  }
  0x68   :  { %2309 = vmatpush1.bf16.msra.mxu0 %v4245_v15  ;;  %v4270_v32 = vld [vmem:[#allocation5 + $0x18c] ss:$28 sps:$4 sm:$0xff]   ;;  %v4272_v35 = vld [vmem:[#allocation5 + $0x158] ss:$28 sps:$4 sm:$0xff]   ;;  %v4276_v36 = vld [vmem:[#allocation5 + $0x1c4] ss:$28 sps:$4 sm:$0xff]  }
  0x69   :  { %2479 = vmatpush1.bf16.msra.mxu1 %v4242_v13  ;;  %2310 = vmatprep.subr.bf16.mxu0 %v4246_v16  ;;  %v4275_v34 = vld [vmem:[#allocation5 + $0x188] ss:$28 sps:$4 sm:$0xff]   ;;  %v4280_v37 = vld [vmem:[#allocation5 + $0x194] ss:$28 sps:$4 sm:$0xff]   ;;  %v4281_v39 = vld [vmem:[#allocation5 + $0x1c0] ss:$28 sps:$4 sm:$0xff]  }
  0x6a   :  { %2480 = vmatprep.subr.bf16.mxu1 %v4250_v17  ;;  %v4278_v38 = vld [vmem:[#allocation5 + $0x190] ss:$28 sps:$4 sm:$0xff]   ;;  %v4282_v40 = vld [vmem:[#allocation5 + $0x1fc] ss:$28 sps:$4 sm:$0xff]   ;;  %v4284_v43 = vld [vmem:[#allocation5 + $0x1c8] ss:$28 sps:$4 sm:$0xff]  }
  0x6b   :  { %v4286_v41 = vld [vmem:[#allocation5 + $0x1cc] ss:$28 sps:$4 sm:$0xff]   ;;  %v4287_v42 = vld [vmem:[#allocation5 + $0x1f8] ss:$28 sps:$4 sm:$0xff]   ;;  %v4292_v45 = vld [vmem:[#allocation5 + $0x204] ss:$28 sps:$4 sm:$0xff]  }
  0x6c   :  { %2311 = vmatpush1.bf16.msra.mxu0 %v4251_v18  ;;  %v4288_v44 = vld [vmem:[#allocation5 + $0x234] ss:$28 sps:$4 sm:$0xff]   ;;  %v4290_v46 = vld [vmem:[#allocation5 + $0x200] ss:$28 sps:$4 sm:$0xff]   ;;  %v4294_v48 = vld [vmem:[#allocation5 + $0x26c] ss:$28 sps:$4 sm:$0xff]  }
  0x6d   :  { %2481 = vmatpush1.bf16.msra.mxu1 %v4248_v19  ;;  %2312 = vmatprep.subr.bf16.mxu0 %v4252_v20  ;;  %v4293_v47 = vld [vmem:[#allocation5 + $0x230] ss:$28 sps:$4 sm:$0xff]   ;;  %v4298_v49 = vld [vmem:[#allocation5 + $0x23c] ss:$28 sps:$4 sm:$0xff]   ;;  %v4299_v53 = vld [vmem:[#allocation5 + $0x268] ss:$28 sps:$4 sm:$0xff]  }
  0x6e   :  { %2482 = vmatprep.subr.bf16.mxu1 %v4256_v21  ;;  %v4296_v50 = vld [vmem:[#allocation5 + $0x238] ss:$28 sps:$4 sm:$0xff]   ;;  %v4300_v55 = vld [vmem:[#allocation5 + $0x2a4] ss:$28 sps:$4 sm:$0xff]   ;;  %v4302_v58 = vld [vmem:[#allocation5 + $0x270] ss:$28 sps:$4 sm:$0xff]  }
  0x6f   :  { %v87_v51 = vld [vmem:[#allocation2 + $0x8] sm:$0xff]  ;;  %v94_v52 = vld [vmem:[#allocation2 + $0x40] sm:$0xff]  ;;  %v4310_v60 = vld [vmem:[#allocation5 + $0x2ac] ss:$28 sps:$4 sm:$0xff]   ;;  %s3603_s30 = sshll.u32 %s4929_s4, 4  ;;  %s3604_s30 = int_to_ptr.vmem [resolvable:$true] %s3603_s30 }
  0x70   :  { %2313 = vmatpush1.bf16.msra.mxu0 %v4257_v23  ;;  %v5027_v54 = vpack.c.bf16 %v94_v52, %v87_v51  ;;  %v4304_v56 = vld [vmem:[#allocation5 + $0x274] ss:$28 sps:$4 sm:$0xff]   ;;  %v4305_v57 = vld [vmem:[#allocation5 + $0x2a0] ss:$28 sps:$4 sm:$0xff]   ;;  %v4308_v62 = vld [vmem:[#allocation5 + $0x2a8] ss:$28 sps:$4 sm:$0xff]   ;;  %p4890_p13 = scmp.lt.s32.totalorder %s3604_s30, %s3604_s30 }
  0x71   :  { %2483 = vmatpush1.bf16.msra.mxu1 %v4254_v22  ;;  %2314 = vmatprep.subr.bf16.mxu0 %v4258_v24  ;;  %v4306_v59 = vld [vmem:[#allocation5 + $0x2dc] ss:$28 sps:$4 sm:$0xff]   ;;  %v4312_v63 = vld [vmem:[#allocation5 + $0x314] ss:$28 sps:$4 sm:$0xff]   ;;  %v4316_v1 = vld [vmem:[#allocation5 + $0x2e4] ss:$28 sps:$4 sm:$0xff]  }
  0x72   :  { %2484 = vmatprep.subr.bf16.mxu1 %v4262_v25  ;;  %2336 = vmatprep.mubr.bf16.mxu0 %v5027_v54  ;;  %v4311_v61 = vld [vmem:[#allocation5 + $0x2d8] ss:$28 sps:$4 sm:$0xff]   ;;  %v4317_v2 = vld [vmem:[#allocation5 + $0x310] ss:$28 sps:$4 sm:$0xff]   ;;  %v4314_v3 = vld [vmem:[#allocation5 + $0x2e0] ss:$28 sps:$4 sm:$0xff]  }
  0x73   :  { %2508 = vmatprep.mubr.bf16.mxu1 %v5027_v54  ;;  %v4318_v4 = vld [vmem:[#allocation5 + $0x34c] ss:$28 sps:$4 sm:$0xff]   ;;  %v4322_v5 = vld [vmem:[#allocation5 + $0x31c] ss:$28 sps:$4 sm:$0xff]   ;;  %v86_v7 = vld [vmem:[#allocation2] sm:$0xff]  ;;  %s4885_s6 = scalar_lea.vmem %s3604_s30, 256 }
  0x74   :  { %2315 = vmatpush1.bf16.msra.mxu0 %v4263_v26  ;;  %v4323_v6 = vld [vmem:[#allocation5 + $0x348] ss:$28 sps:$4 sm:$0xff]   ;;  %v4320_v9 = vld [vmem:[#allocation5 + $0x318] ss:$28 sps:$4 sm:$0xff]   ;;  %v4324_v14 = vld [vmem:[#allocation5 + $0x380] ss:$28 sps:$4 sm:$0xff]   ;;  %p4886_p12 = scmp.ne.s32.totalorder %s3604_s30, %s4885_s6  ;;  %p4891_p0 = scmp.lt.s32.totalorder %s4885_s6, %s4885_s6 }
  0x75   :  { %2485 = vmatpush1.bf16.msra.mxu1 %v4260_v27  ;;  %2316 = vmatprep.subr.bf16.mxu0 %v4264_v28  ;;  %v93_v8 = vld [vmem:[#allocation2 + $0x38] sm:$0xff]  ;;  %v4326_v10 = vld [vmem:[#allocation5 + $0x384] ss:$28 sps:$4 sm:$0xff]   ;;  %v4329_v12 = vld [vmem:[#allocation5 + $0x354] ss:$28 sps:$4 sm:$0xff]  }
  0x76   :  { %2486 = vmatprep.subr.bf16.mxu1 %v4268_v29  ;;  %v5031_v13 = vpack.c.bf16 %v93_v8, %v86_v7  ;;  %v4327_v15 = vld [vmem:[#allocation5 + $0x350] ss:$28 sps:$4 sm:$0xff]   ;;  %v4332_v16 = vld [vmem:[#allocation5 + $0x3bc] ss:$28 sps:$4 sm:$0xff]   ;;  %v4333_v19 = vld [vmem:[#allocation5 + $0x388] ss:$28 sps:$4 sm:$0xff]   ;;  %p4892_p1 = por %p4891_p0, %p4890_p13 }
  0x77   :  { %v4335_v17 = vld [vmem:[#allocation5 + $0x38c] ss:$28 sps:$4 sm:$0xff]   ;;  %v4330_v18 = vld [vmem:[#allocation5 + $0x3b8] ss:$28 sps:$4 sm:$0xff]   ;;  %v4341_v21 = vld [vmem:[#allocation5 + $0x3c4] ss:$28 sps:$4 sm:$0xff]  }
  0x78   :  { %2317 = vmatpush1.bf16.msra.mxu0 %v4269_v31  ;;  %v4338_v20 = vld [vmem:[#allocation5 + $0x3f4] ss:$28 sps:$4 sm:$0xff]   ;;  %v4339_v23 = vld [vmem:[#allocation5 + $0x3c0] ss:$28 sps:$4 sm:$0xff]   ;;  %v4344_v24 = vld [vmem:[#allocation5 + $0x42c] ss:$28 sps:$4 sm:$0xff]   ;;  %p4893_p2 = pnand %p4892_p1, %p4886_p12 }
  0x79   :  { %2487 = vmatpush1.bf16.msra.mxu1 %v4266_v30  ;;  %2318 = vmatprep.subr.bf16.mxu0 %v4270_v32  ;;  %v4336_v22 = vld [vmem:[#allocation5 + $0x3f0] ss:$28 sps:$4 sm:$0xff]   ;;  %v4347_v25 = vld [vmem:[#allocation5 + $0x3fc] ss:$28 sps:$4 sm:$0xff]   ;;  %v4342_v26 = vld [vmem:[#allocation5 + $0x428] ss:$28 sps:$4 sm:$0xff]  }
  0x7a   :  { %2488 = vmatprep.subr.bf16.mxu1 %v4274_v33  ;;  %v4345_v27 = vld [vmem:[#allocation5 + $0x3f8] ss:$28 sps:$4 sm:$0xff]   ;;  %v4350_v28 = vld [vmem:[#allocation5 + $0x464] ss:$28 sps:$4 sm:$0xff]   ;;  %v4351_v31 = vld [vmem:[#allocation5 + $0x430] ss:$28 sps:$4 sm:$0xff]  }
  0x7b   :  { %v4353_v29 = vld [vmem:[#allocation5 + $0x434] ss:$28 sps:$4 sm:$0xff]   ;;  %v4348_v30 = vld [vmem:[#allocation5 + $0x460] ss:$28 sps:$4 sm:$0xff]   ;;  %v4359_v33 = vld [vmem:[#allocation5 + $0x46c] ss:$28 sps:$4 sm:$0xff]  }
  0x7c   :  { %2319 = vmatpush1.bf16.msra.mxu0 %v4275_v34  ;;  %v4356_v32 = vld [vmem:[#allocation5 + $0x49c] ss:$28 sps:$4 sm:$0xff]   ;;  %v4383_v52 = vld [vmem:[#allocation5 + $0x54c] ss:$28 sps:$4 sm:$0xff]  }
  0x7d   :  { %2489 = vmatpush1.bf16.msra.mxu1 %v4272_v35  ;;  %2320 = vmatprep.subr.bf16.mxu0 %v4276_v36  ;;  %v4354_v34 = vld [vmem:[#allocation5 + $0x498] ss:$28 sps:$4 sm:$0xff]   ;;  %v4357_v35 = vld [vmem:[#allocation5 + $0x468] ss:$28 sps:$4 sm:$0xff]  }
  0x7e   :  { %2490 = vmatprep.subr.bf16.mxu1 %v4280_v37  ;;  %v4362_v36 = vld [vmem:[#allocation5 + $0x4d4] ss:$28 sps:$4 sm:$0xff]   ;;  %v4365_v37 = vld [vmem:[#allocation5 + $0x4a4] ss:$28 sps:$4 sm:$0xff]   ;;  %v4380_v51 = vld [vmem:[#allocation5 + $0x57c] ss:$28 sps:$4 sm:$0xff]  }
  0x7f   :  { %v4402_v7 = vld [vmem:[#allocation5 + $0x658] ss:$28 sps:$4 sm:$0xff]   ;;  %v4405_v8 = vld [vmem:[#allocation5 + $0x628] ss:$28 sps:$4 sm:$0xff]  }
  0x80   :  { %2321 = vmatpush1.bf16.msra.mxu0 %v4281_v39  ;;  %v89_v39 = vld [vmem:[#allocation2 + $0x18] sm:$0xff] }
  0x81   :  { %2491 = vmatpush1.bf16.msra.mxu1 %v4278_v38  ;;  %2322 = vmatprep.subr.bf16.mxu0 %v4282_v40  ;;  %v4360_v38 = vld [vmem:[#allocation5 + $0x4d0] ss:$28 sps:$4 sm:$0xff]   ;;  %v96_v40 = vld [vmem:[#allocation2 + $0x50] sm:$0xff] }
  0x82   :  { %2492 = vmatprep.subr.bf16.mxu1 %v4286_v41  ;;  %v4363_v41 = vld [vmem:[#allocation5 + $0x4a0] ss:$28 sps:$4 sm:$0xff]  }
  0x84   :  { %2323 = vmatpush1.bf16.msra.mxu0 %v4287_v42  ;;  %v5035_v42 = vpack.c.bf16 %v96_v40, %v89_v39  ;;  %v4438_v39 = vld [vmem:[#allocation5 + $0x7a8] ss:$28 sps:$4 sm:$0xff]   ;;  %v4441_v40 = vld [vmem:[#allocation5 + $0x778] ss:$28 sps:$4 sm:$0xff]  }
  0x85   :  { %2493 = vmatpush1.bf16.msra.mxu1 %v4284_v43  ;;  %2324 = vmatprep.subr.bf16.mxu0 %v4288_v44  ;;  %v4368_v43 = vld [vmem:[#allocation5 + $0x50c] ss:$28 sps:$4 sm:$0xff]   ;;  %v4371_v44 = vld [vmem:[#allocation5 + $0x4dc] ss:$28 sps:$4 sm:$0xff]  }
  0x86   :  { %2494 = vmatprep.subr.bf16.mxu1 %v4292_v45  ;;  %v4366_v45 = vld [vmem:[#allocation5 + $0x508] ss:$28 sps:$4 sm:$0xff]  }
  0x88   :  { %2325 = vmatpush1.bf16.msra.mxu0 %v4293_v47  ;;  %v4374_v47 = vld [vmem:[#allocation5 + $0x544] ss:$28 sps:$4 sm:$0xff]  }
  0x89   :  { %2495 = vmatpush1.bf16.msra.mxu1 %v4290_v46  ;;  %2326 = vmatprep.subr.bf16.mxu0 %v4294_v48  ;;  %v4369_v46 = vld [vmem:[#allocation5 + $0x4d8] ss:$28 sps:$4 sm:$0xff]  }
  0x8a   :  { %2496 = vmatprep.subr.bf16.mxu1 %v4298_v49  ;;  %v4377_v48 = vld [vmem:[#allocation5 + $0x514] ss:$28 sps:$4 sm:$0xff]   ;;  %v4372_v49 = vld [vmem:[#allocation5 + $0x540] ss:$28 sps:$4 sm:$0xff]  }
  0x8c   :  { %2327 = vmatpush1.bf16.msra.mxu0 %v4299_v53  ;;  %v4378_v53 = vld [vmem:[#allocation5 + $0x578] ss:$28 sps:$4 sm:$0xff]  }
  0x8d   :  { %2497 = vmatpush1.bf16.msra.mxu1 %v4296_v50  ;;  %2328 = vmatprep.subr.bf16.mxu0 %v4300_v55  ;;  %v4375_v50 = vld [vmem:[#allocation5 + $0x510] ss:$28 sps:$4 sm:$0xff]   ;;  %v4381_v55 = vld [vmem:[#allocation5 + $0x548] ss:$28 sps:$4 sm:$0xff]  }
  0x8e   :  { %2498 = vmatprep.subr.bf16.mxu1 %v4304_v56  ;;  %v4386_v56 = vld [vmem:[#allocation5 + $0x5b4] ss:$28 sps:$4 sm:$0xff]  }
  0x90   :  { %2329 = vmatpush1.bf16.msra.mxu0 %v4305_v57  ;;  %v4389_v57 = vld [vmem:[#allocation5 + $0x584] ss:$28 sps:$4 sm:$0xff]  }
  0x91   :  { %2499 = vmatpush1.bf16.msra.mxu1 %v4302_v58  ;;  %2330 = vmatprep.subr.bf16.mxu0 %v4306_v59  ;;  %v4384_v58 = vld [vmem:[#allocation5 + $0x5b0] ss:$28 sps:$4 sm:$0xff]   ;;  %v4387_v59 = vld [vmem:[#allocation5 + $0x580] ss:$28 sps:$4 sm:$0xff]  }
  0x92   :  { %2500 = vmatprep.subr.bf16.mxu1 %v4310_v60  ;;  %v4392_v60 = vld [vmem:[#allocation5 + $0x5ec] ss:$28 sps:$4 sm:$0xff]  }
  0x94   :  { %2331 = vmatpush1.bf16.msra.mxu0 %v4311_v61  ;;  %v4395_v61 = vld [vmem:[#allocation5 + $0x5bc] ss:$28 sps:$4 sm:$0xff]  }
  0x95   :  { %2501 = vmatpush1.bf16.msra.mxu1 %v4308_v62  ;;  %2332 = vmatprep.subr.bf16.mxu0 %v4312_v63  ;;  %v4390_v62 = vld [vmem:[#allocation5 + $0x5e8] ss:$28 sps:$4 sm:$0xff]   ;;  %v4393_v63 = vld [vmem:[#allocation5 + $0x5b8] ss:$28 sps:$4 sm:$0xff]  }
  0x96   :  { %2502 = vmatprep.subr.bf16.mxu1 %v4316_v1  ;;  %v4398_v1 = vld [vmem:[#allocation5 + $0x624] ss:$28 sps:$4 sm:$0xff]  }
  0x98   :  { %2333 = vmatpush1.bf16.msra.mxu0 %v4317_v2  ;;  %v4401_v2 = vld [vmem:[#allocation5 + $0x5f4] ss:$28 sps:$4 sm:$0xff]  }
  0x99   :  { %2503 = vmatpush1.bf16.msra.mxu1 %v4314_v3  ;;  %2334 = vmatprep.subr.bf16.mxu0 %v4318_v4  ;;  %v4396_v3 = vld [vmem:[#allocation5 + $0x620] ss:$28 sps:$4 sm:$0xff]   ;;  %v4399_v4 = vld [vmem:[#allocation5 + $0x5f0] ss:$28 sps:$4 sm:$0xff]  }
  0x9a   :  { %2504 = vmatprep.subr.bf16.mxu1 %v4322_v5  ;;  %v4404_v5 = vld [vmem:[#allocation5 + $0x65c] ss:$28 sps:$4 sm:$0xff]  }
  0x9c   :  { %2335 = vmatpush1.bf16.msra.mxu0 %v4323_v6  ;;  %v4407_v6 = vld [vmem:[#allocation5 + $0x62c] ss:$28 sps:$4 sm:$0xff]  }
  0x9d   :  { %2505 = vmatpush1.bf16.msra.mxu1 %v4320_v9  ;;  %2347 = vmatprep.subr.bf16.mxu0 %v4326_v10  ;;  %v4410_v9 = vld [vmem:[#allocation5 + $0x694] ss:$28 sps:$4 sm:$0xff]   ;;  %v4413_v10 = vld [vmem:[#allocation5 + $0x664] ss:$28 sps:$4 sm:$0xff]  }
  0x9e   :  { %2506 = vmatprep.subr.bf16.mxu1 %v4329_v12  ;;  %v4408_v12 = vld [vmem:[#allocation5 + $0x690] ss:$28 sps:$4 sm:$0xff]  }
  0x9f   :  { %2337 = vmatmul.mubr.bf16.vlgmr.msra.gmra.mrb[0].mxu0 %v5031_v13 }
  0xa0   :  { %2348 = vmatpush1.bf16.msra.mxu0 %v4324_v14  ;;  %2379 = vmatprep.mubr.bf16.mxu0 %v5035_v42  ;;  %v4411_v14 = vld [vmem:[#allocation5 + $0x660] ss:$28 sps:$4 sm:$0xff]  }
  0xa1   :  { %2507 = vmatpush1.bf16.msra.mxu1 %v4327_v15  ;;  %2349 = vmatprep.subr.bf16.mxu0 %v4332_v16  ;;  %v4416_v15 = vld [vmem:[#allocation5 + $0x6cc] ss:$28 sps:$4 sm:$0xff]   ;;  %v4419_v16 = vld [vmem:[#allocation5 + $0x69c] ss:$28 sps:$4 sm:$0xff]  }
  0xa2   :  { %2519 = vmatprep.subr.bf16.mxu1 %v4335_v17  ;;  %v4414_v17 = vld [vmem:[#allocation5 + $0x6c8] ss:$28 sps:$4 sm:$0xff]  }
  0xa4   :  { %2350 = vmatpush1.bf16.msra.mxu0 %v4330_v18  ;;  %2509 = vmatmul.mubr.bf16.vlgmr.msra.gmra.mrb[4].mxu1 %v5031_v13  ;;  %v88_v18 = vld [vmem:[#allocation2 + $0x10] sm:$0xff] }
  0xa5   :  { %2520 = vmatpush1.bf16.msra.mxu1 %v4333_v19  ;;  %2351 = vmatprep.subr.bf16.mxu0 %v4338_v20  ;;  %v95_v19 = vld [vmem:[#allocation2 + $0x48] sm:$0xff] }
  0xa6   :  { %2521 = vmatprep.subr.bf16.mxu1 %v4341_v21  ;;  %2551 = vmatprep.mubr.bf16.mxu1 %v5035_v42  ;;  %v4417_v20 = vld [vmem:[#allocation5 + $0x698] ss:$28 sps:$4 sm:$0xff]   ;;  %v4422_v21 = vld [vmem:[#allocation5 + $0x704] ss:$28 sps:$4 sm:$0xff]  }
  0xa8   :  { %2352 = vmatpush1.bf16.msra.mxu0 %v4336_v22  ;;  %v4425_v22 = vld [vmem:[#allocation5 + $0x6d4] ss:$28 sps:$4 sm:$0xff]  }
  0xa9   :  { %2522 = vmatpush1.bf16.msra.mxu1 %v4339_v23  ;;  %2353 = vmatprep.subr.bf16.mxu0 %v4344_v24  ;;  %v5039_v23 = vpack.c.bf16 %v95_v19, %v88_v18  ;;  %v4420_v24 = vld [vmem:[#allocation5 + $0x700] ss:$28 sps:$4 sm:$0xff]   ;;  %v4503_v19 = vld [vmem:[#allocation5 + $0x9ac] ss:$28 sps:$4 sm:$0xff]  }
  0xaa   :  { %2523 = vmatprep.subr.bf16.mxu1 %v4347_v25  ;;  %v4423_v25 = vld [vmem:[#allocation5 + $0x6d0] ss:$28 sps:$4 sm:$0xff]   ;;  %v4500_v18 = vld [vmem:[#allocation5 + $0x9dc] ss:$28 sps:$4 sm:$0xff]  }
  0xac   :  { %2354 = vmatpush1.bf16.msra.mxu0 %v4342_v26  ;;  %v4428_v26 = vld [vmem:[#allocation5 + $0x73c] ss:$28 sps:$4 sm:$0xff]  }
  0xad   :  { %2524 = vmatpush1.bf16.msra.mxu1 %v4345_v27  ;;  %2355 = vmatprep.subr.bf16.mxu0 %v4350_v28  ;;  %v4431_v27 = vld [vmem:[#allocation5 + $0x70c] ss:$28 sps:$4 sm:$0xff]   ;;  %v91_v28 = vld [vmem:[#allocation2 + $0x28] sm:$0xff] }
  0xae   :  { %2525 = vmatprep.subr.bf16.mxu1 %v4353_v29  ;;  %v98_v29 = vld [vmem:[#allocation2 + $0x60] sm:$0xff] }
  0xb0   :  { %2356 = vmatpush1.bf16.msra.mxu0 %v4348_v30  ;;  %v4426_v30 = vld [vmem:[#allocation5 + $0x738] ss:$28 sps:$4 sm:$0xff]  }
  0xb1   :  { %2526 = vmatpush1.bf16.msra.mxu1 %v4351_v31  ;;  %2357 = vmatprep.subr.bf16.mxu0 %v4356_v32  ;;  %v5042_v31 = vpack.c.bf16 %v98_v29, %v91_v28  ;;  %v4429_v32 = vld [vmem:[#allocation5 + $0x708] ss:$28 sps:$4 sm:$0xff]   ;;  %v4515_v29 = vld [vmem:[#allocation5 + $0xa1c] ss:$28 sps:$4 sm:$0xff]  }
  0xb2   :  { %2527 = vmatprep.subr.bf16.mxu1 %v4359_v33  ;;  %v4434_v33 = vld [vmem:[#allocation5 + $0x774] ss:$28 sps:$4 sm:$0xff]   ;;  %v4510_v28 = vld [vmem:[#allocation5 + $0xa48] ss:$28 sps:$4 sm:$0xff]  }
  0xb4   :  { %2358 = vmatpush1.bf16.msra.mxu0 %v4354_v34  ;;  %v4437_v34 = vld [vmem:[#allocation5 + $0x744] ss:$28 sps:$4 sm:$0xff]  }
  0xb5   :  { %2528 = vmatpush1.bf16.msra.mxu1 %v4357_v35  ;;  %2359 = vmatprep.subr.bf16.mxu0 %v4362_v36  ;;  %v4432_v35 = vld [vmem:[#allocation5 + $0x770] ss:$28 sps:$4 sm:$0xff]   ;;  %v4435_v36 = vld [vmem:[#allocation5 + $0x740] ss:$28 sps:$4 sm:$0xff]  }
  0xb6   :  { %2529 = vmatprep.subr.bf16.mxu1 %v4365_v37  ;;  %v4440_v37 = vld [vmem:[#allocation5 + $0x7ac] ss:$28 sps:$4 sm:$0xff]  }
  0xb8   :  { %2360 = vmatpush1.bf16.msra.mxu0 %v4360_v38  ;;  %v4443_v38 = vld [vmem:[#allocation5 + $0x77c] ss:$28 sps:$4 sm:$0xff]  }
  0xb9   :  { %2530 = vmatpush1.bf16.msra.mxu1 %v4363_v41  ;;  %2361 = vmatprep.subr.bf16.mxu0 %v4368_v43  ;;  %v4446_v41 = vld [vmem:[#allocation5 + $0x7e4] ss:$28 sps:$4 sm:$0xff]   ;;  %v4449_v43 = vld [vmem:[#allocation5 + $0x7b4] ss:$28 sps:$4 sm:$0xff]  }
  0xba   :  { %2531 = vmatprep.subr.bf16.mxu1 %v4371_v44  ;;  %v4444_v44 = vld [vmem:[#allocation5 + $0x7e0] ss:$28 sps:$4 sm:$0xff]  }
  0xbc   :  { %2362 = vmatpush1.bf16.msra.mxu0 %v4366_v45  ;;  %v4447_v45 = vld [vmem:[#allocation5 + $0x7b0] ss:$28 sps:$4 sm:$0xff]  }
  0xbd   :  { %2532 = vmatpush1.bf16.msra.mxu1 %v4369_v46  ;;  %2363 = vmatprep.subr.bf16.mxu0 %v4374_v47  ;;  %v4452_v46 = vld [vmem:[#allocation5 + $0x81c] ss:$28 sps:$4 sm:$0xff]   ;;  %v4455_v47 = vld [vmem:[#allocation5 + $0x7ec] ss:$28 sps:$4 sm:$0xff]  }
  0xbe   :  { %2533 = vmatprep.subr.bf16.mxu1 %v4377_v48  ;;  %v4450_v48 = vld [vmem:[#allocation5 + $0x818] ss:$28 sps:$4 sm:$0xff]  }
  0xc0   :  { %2364 = vmatpush1.bf16.msra.mxu0 %v4372_v49  ;;  %v4453_v49 = vld [vmem:[#allocation5 + $0x7e8] ss:$28 sps:$4 sm:$0xff]  }
  0xc1   :  { %2534 = vmatpush1.bf16.msra.mxu1 %v4375_v50  ;;  %2365 = vmatprep.subr.bf16.mxu0 %v4380_v51  ;;  %v4458_v50 = vld [vmem:[#allocation5 + $0x854] ss:$28 sps:$4 sm:$0xff]   ;;  %v4461_v51 = vld [vmem:[#allocation5 + $0x824] ss:$28 sps:$4 sm:$0xff]  }
  0xc2   :  { %2535 = vmatprep.subr.bf16.mxu1 %v4383_v52  ;;  %v4456_v52 = vld [vmem:[#allocation5 + $0x850] ss:$28 sps:$4 sm:$0xff]  }
  0xc4   :  { %2366 = vmatpush1.bf16.msra.mxu0 %v4378_v53  ;;  %v4459_v53 = vld [vmem:[#allocation5 + $0x820] ss:$28 sps:$4 sm:$0xff]  }
  0xc5   :  { %2536 = vmatpush1.bf16.msra.mxu1 %v4381_v55  ;;  %2367 = vmatprep.subr.bf16.mxu0 %v4386_v56  ;;  %v4464_v55 = vld [vmem:[#allocation5 + $0x88c] ss:$28 sps:$4 sm:$0xff]   ;;  %v4467_v56 = vld [vmem:[#allocation5 + $0x85c] ss:$28 sps:$4 sm:$0xff]  }
  0xc6   :  { %2537 = vmatprep.subr.bf16.mxu1 %v4389_v57  ;;  %v4462_v57 = vld [vmem:[#allocation5 + $0x888] ss:$28 sps:$4 sm:$0xff]  }
  0xc8   :  { %2368 = vmatpush1.bf16.msra.mxu0 %v4384_v58  ;;  %v4465_v58 = vld [vmem:[#allocation5 + $0x858] ss:$28 sps:$4 sm:$0xff]  }
  0xc9   :  { %2538 = vmatpush1.bf16.msra.mxu1 %v4387_v59  ;;  %2369 = vmatprep.subr.bf16.mxu0 %v4392_v60  ;;  %v4470_v59 = vld [vmem:[#allocation5 + $0x8c4] ss:$28 sps:$4 sm:$0xff]   ;;  %v4473_v60 = vld [vmem:[#allocation5 + $0x894] ss:$28 sps:$4 sm:$0xff]  }
  0xca   :  { %2539 = vmatprep.subr.bf16.mxu1 %v4395_v61  ;;  %v4468_v61 = vld [vmem:[#allocation5 + $0x8c0] ss:$28 sps:$4 sm:$0xff]  }
  0xcc   :  { %2370 = vmatpush1.bf16.msra.mxu0 %v4390_v62  ;;  %v4471_v62 = vld [vmem:[#allocation5 + $0x890] ss:$28 sps:$4 sm:$0xff]  }
  0xcd   :  { %2540 = vmatpush1.bf16.msra.mxu1 %v4393_v63  ;;  %2371 = vmatprep.subr.bf16.mxu0 %v4398_v1  ;;  %v4476_v63 = vld [vmem:[#allocation5 + $0x8fc] ss:$28 sps:$4 sm:$0xff]   ;;  %v4479_v1 = vld [vmem:[#allocation5 + $0x8cc] ss:$28 sps:$4 sm:$0xff]  }
  0xce   :  { %2541 = vmatprep.subr.bf16.mxu1 %v4401_v2  ;;  %v4474_v2 = vld [vmem:[#allocation5 + $0x8f8] ss:$28 sps:$4 sm:$0xff]  }
  0xd0   :  { %2372 = vmatpush1.bf16.msra.mxu0 %v4396_v3  ;;  %v4477_v3 = vld [vmem:[#allocation5 + $0x8c8] ss:$28 sps:$4 sm:$0xff]  }
  0xd1   :  { %2542 = vmatpush1.bf16.msra.mxu1 %v4399_v4  ;;  %2373 = vmatprep.subr.bf16.mxu0 %v4404_v5  ;;  %v4482_v4 = vld [vmem:[#allocation5 + $0x934] ss:$28 sps:$4 sm:$0xff]   ;;  %v4485_v5 = vld [vmem:[#allocation5 + $0x904] ss:$28 sps:$4 sm:$0xff]  }
  0xd2   :  { %2543 = vmatprep.subr.bf16.mxu1 %v4407_v6  ;;  %v4480_v6 = vld [vmem:[#allocation5 + $0x930] ss:$28 sps:$4 sm:$0xff]  }
  0xd4   :  { %2374 = vmatpush1.bf16.msra.mxu0 %v4402_v7  ;;  %v4483_v7 = vld [vmem:[#allocation5 + $0x900] ss:$28 sps:$4 sm:$0xff]  }
  0xd5   :  { %2544 = vmatpush1.bf16.msra.mxu1 %v4405_v8  ;;  %2375 = vmatprep.subr.bf16.mxu0 %v4410_v9  ;;  %v4488_v8 = vld [vmem:[#allocation5 + $0x96c] ss:$28 sps:$4 sm:$0xff]   ;;  %v4491_v9 = vld [vmem:[#allocation5 + $0x93c] ss:$28 sps:$4 sm:$0xff]  }
  0xd6   :  { %2545 = vmatprep.subr.bf16.mxu1 %v4413_v10  ;;  %v4486_v10 = vld [vmem:[#allocation5 + $0x968] ss:$28 sps:$4 sm:$0xff]  }
  0xd8   :  { %2376 = vmatpush1.bf16.msra.mxu0 %v4408_v12  ;;  %v4489_v12 = vld [vmem:[#allocation5 + $0x938] ss:$28 sps:$4 sm:$0xff]  }
  0xd9   :  { %2546 = vmatpush1.bf16.msra.mxu1 %v4411_v14  ;;  %2377 = vmatprep.subr.bf16.mxu0 %v4416_v15  ;;  %v4494_v14 = vld [vmem:[#allocation5 + $0x9a4] ss:$28 sps:$4 sm:$0xff]   ;;  %v4497_v15 = vld [vmem:[#allocation5 + $0x974] ss:$28 sps:$4 sm:$0xff]  }
  0xda   :  { %2547 = vmatprep.subr.bf16.mxu1 %v4419_v16  ;;  %v4492_v16 = vld [vmem:[#allocation5 + $0x9a0] ss:$28 sps:$4 sm:$0xff]  }
  0xdc   :  { %2378 = vmatpush1.bf16.msra.mxu0 %v4414_v17  ;;  %v4495_v17 = vld [vmem:[#allocation5 + $0x970] ss:$28 sps:$4 sm:$0xff]  }
  0xdd   :  { %2548 = vmatpush1.bf16.msra.mxu1 %v4417_v20  ;;  %2390 = vmatprep.subr.bf16.mxu0 %v4422_v21  ;;  %v4498_v20 = vld [vmem:[#allocation5 + $0x9d8] ss:$28 sps:$4 sm:$0xff]   ;;  %v4501_v21 = vld [vmem:[#allocation5 + $0x9a8] ss:$28 sps:$4 sm:$0xff]  }
  0xde   :  { %2549 = vmatprep.subr.bf16.mxu1 %v4425_v22  ;;  %v4506_v22 = vld [vmem:[#allocation5 + $0xa14] ss:$28 sps:$4 sm:$0xff]  }
  0xdf   :  { %2380 = vmatmul.mubr.bf16.vlgmr.msra.gmra.mrb[0].mxu0 %v5039_v23 }
  0xe0   :  { %2391 = vmatpush1.bf16.msra.mxu0 %v4420_v24  ;;  %2422 = vmatprep.mubr.bf16.mxu0 %v5042_v31  ;;  %v4509_v24 = vld [vmem:[#allocation5 + $0x9e4] ss:$28 sps:$4 sm:$0xff]  }
  0xe1   :  { %2550 = vmatpush1.bf16.msra.mxu1 %v4423_v25  ;;  %2392 = vmatprep.subr.bf16.mxu0 %v4428_v26  ;;  %v4504_v25 = vld [vmem:[#allocation5 + $0xa10] ss:$28 sps:$4 sm:$0xff]   ;;  %v4507_v26 = vld [vmem:[#allocation5 + $0x9e0] ss:$28 sps:$4 sm:$0xff]  }
  0xe2   :  { %2562 = vmatprep.subr.bf16.mxu1 %v4431_v27  ;;  %v4512_v27 = vld [vmem:[#allocation5 + $0xa4c] ss:$28 sps:$4 sm:$0xff]  }
  0xe4   :  { %2393 = vmatpush1.bf16.msra.mxu0 %v4426_v30  ;;  %2552 = vmatmul.mubr.bf16.vlgmr.msra.gmra.mrb[4].mxu1 %v5039_v23  ;;  %v4513_v30 = vld [vmem:[#allocation5 + $0xa18] ss:$28 sps:$4 sm:$0xff]  }
  0xe5   :  { %2563 = vmatpush1.bf16.msra.mxu1 %v4429_v32  ;;  %2394 = vmatprep.subr.bf16.mxu0 %v4434_v33  ;;  %v90_v32 = vld [vmem:[#allocation2 + $0x20] sm:$0xff]  ;;  %v97_v33 = vld [vmem:[#allocation2 + $0x58] sm:$0xff] }
  0xe6   :  { %2564 = vmatprep.subr.bf16.mxu1 %v4437_v34  ;;  %2594 = vmatprep.mubr.bf16.mxu1 %v5042_v31  ;;  %v4521_v34 = vld [vmem:[#allocation5 + $0x14] ss:$28 sps:$4 sm:$0xff]  }
  0xe8   :  { %2395 = vmatpush1.bf16.msra.mxu0 %v4432_v35  ;;  %v4518_v35 = vld [vmem:[#allocation5 + $0xa54] ss:$28 sps:$4 sm:$0xff]  }
  0xe9   :  { %2565 = vmatpush1.bf16.msra.mxu1 %v4435_v36  ;;  %2396 = vmatprep.subr.bf16.mxu0 %v4440_v37  ;;  %v5047_v36 = vpack.c.bf16 %v97_v33, %v90_v32  ;;  %v4516_v37 = vld [vmem:[#allocation5 + $0xa50] ss:$28 sps:$4 sm:$0xff]   ;;  %v4575_v32 = vld [vmem:[#allocation5 + $0x324] ss:$28 sps:$4 sm:$0xff]  }
  0xea   :  { %2566 = vmatprep.subr.bf16.mxu1 %v4443_v38  ;;  %v4519_v38 = vld [vmem:[#allocation5 + $0x10] ss:$28 sps:$4 sm:$0xff]  }
  0xeb   :  { %v4601_v33 = vld [vmem:[#allocation5 + $0x3d0] ss:$28 sps:$4 sm:$0xff]  }
  0xec   :  { %2397 = vmatpush1.bf16.msra.mxu0 %v4438_v39  ;;  %v4524_v39 = vld [vmem:[#allocation5 + $0x4c] ss:$28 sps:$4 sm:$0xff]  }
  0xed   :  { %2567 = vmatpush1.bf16.msra.mxu1 %v4441_v40  ;;  %2398 = vmatprep.subr.bf16.mxu0 %v4446_v41  ;;  %v4530_v40 = vld [vmem:[#allocation5 + $0xa8c] ss:$28 sps:$4 sm:$0xff]  }
  0xee   :  { %2568 = vmatprep.subr.bf16.mxu1 %v4449_v43  ;;  %v4522_v41 = vld [vmem:[#allocation5 + $0x48] ss:$28 sps:$4 sm:$0xff]  }
  0xef   :  { %v4527_v43 = vld [vmem:[#allocation5 + $0x84] ss:$28 sps:$4 sm:$0xff]  }
  0xf0   :  { %2399 = vmatpush1.bf16.msra.mxu0 %v4444_v44  ;;  %v4528_v44 = vld [vmem:[#allocation5 + $0xa88] ss:$28 sps:$4 sm:$0xff]  }
  0xf1   :  { %2569 = vmatpush1.bf16.msra.mxu1 %v4447_v45  ;;  %2400 = vmatprep.subr.bf16.mxu0 %v4452_v46  ;;  %v4552_v45 = vld [vmem:[#allocation5 + $0x1d8] ss:$28 sps:$4 sm:$0xff]   ;;  %v4525_v46 = vld [vmem:[#allocation5 + $0x80] ss:$28 sps:$4 sm:$0xff]  }
  0xf2   :  { %2570 = vmatprep.subr.bf16.mxu1 %v4455_v47  ;;  %v4533_v47 = vld [vmem:[#allocation5 + $0xbc] ss:$28 sps:$4 sm:$0xff]  }
  0xf4   :  { %2401 = vmatpush1.bf16.msra.mxu0 %v4450_v48  ;;  %v4531_v48 = vld [vmem:[#allocation5 + $0xb8] ss:$28 sps:$4 sm:$0xff]  }
  0xf5   :  { %2571 = vmatpush1.bf16.msra.mxu1 %v4453_v49  ;;  %2402 = vmatprep.subr.bf16.mxu0 %v4458_v50  ;;  %v4536_v49 = vld [vmem:[#allocation5 + $0xf4] ss:$28 sps:$4 sm:$0xff]  }
  0xf6   :  { %2572 = vmatprep.subr.bf16.mxu1 %v4461_v51  ;;  %v4534_v50 = vld [vmem:[#allocation5 + $0xf0] ss:$28 sps:$4 sm:$0xff]  }
  0xf7   :  { %v4539_v51 = vld [vmem:[#allocation5 + $0x12c] ss:$28 sps:$4 sm:$0xff]  }
  0xf8   :  { %2403 = vmatpush1.bf16.msra.mxu0 %v4456_v52  ;;  %v4556_v52 = vld [vmem:[#allocation5 + $0x18] ss:$28 sps:$4 sm:$0xff]  }
  0xf9   :  { %2573 = vmatpush1.bf16.msra.mxu1 %v4459_v53  ;;  %2404 = vmatprep.subr.bf16.mxu0 %v4464_v55  ;;  %v4557_v53 = vld [vmem:[#allocation5 + $0x210] ss:$28 sps:$4 sm:$0xff]   ;;  %v4537_v55 = vld [vmem:[#allocation5 + $0x128] ss:$28 sps:$4 sm:$0xff]  }
  0xfa   :  { %2574 = vmatprep.subr.bf16.mxu1 %v4467_v56  ;;  %v4542_v56 = vld [vmem:[#allocation5 + $0x164] ss:$28 sps:$4 sm:$0xff]  }
  0xfc   :  { %2405 = vmatpush1.bf16.msra.mxu0 %v4462_v57  ;;  %v4561_v57 = vld [vmem:[#allocation5 + $0x50] ss:$28 sps:$4 sm:$0xff]  }
  0xfd   :  { %2575 = vmatpush1.bf16.msra.mxu1 %v4465_v58  ;;  %2406 = vmatprep.subr.bf16.mxu0 %v4470_v59  ;;  %v4562_v58 = vld [vmem:[#allocation5 + $0x248] ss:$28 sps:$4 sm:$0xff]   ;;  %v4540_v59 = vld [vmem:[#allocation5 + $0x160] ss:$28 sps:$4 sm:$0xff]  }
  0xfe   :  { %2576 = vmatprep.subr.bf16.mxu1 %v4473_v60  ;;  %v4545_v60 = vld [vmem:[#allocation5 + $0x19c] ss:$28 sps:$4 sm:$0xff]  }
 0x100   :  { %2407 = vmatpush1.bf16.msra.mxu0 %v4468_v61  ;;  %v4566_v61 = vld [vmem:[#allocation5 + $0x88] ss:$28 sps:$4 sm:$0xff]  }
 0x101   :  { %2577 = vmatpush1.bf16.msra.mxu1 %v4471_v62  ;;  %2408 = vmatprep.subr.bf16.mxu0 %v4476_v63  ;;  %v4567_v62 = vld [vmem:[#allocation5 + $0x280] ss:$28 sps:$4 sm:$0xff]   ;;  %v4543_v63 = vld [vmem:[#allocation5 + $0x198] ss:$28 sps:$4 sm:$0xff]  }
 0x102   :  { %2578 = vmatprep.subr.bf16.mxu1 %v4479_v1 }
 0x104   :  { %2409 = vmatpush1.bf16.msra.mxu0 %v4474_v2  ;;  %v4548_v2 = vld [vmem:[#allocation5 + $0x1d4] ss:$28 sps:$4 sm:$0xff]  }
 0x105   :  { %2579 = vmatpush1.bf16.msra.mxu1 %v4477_v3  ;;  %2410 = vmatprep.subr.bf16.mxu0 %v4482_v4  ;;  %v4571_v3 = vld [vmem:[#allocation5 + $0xc0] ss:$28 sps:$4 sm:$0xff]  }
 0x106   :  { %2580 = vmatprep.subr.bf16.mxu1 %v4485_v5 }
 0x108   :  { %2411 = vmatpush1.bf16.msra.mxu0 %v4480_v6 }
 0x109   :  { %2581 = vmatpush1.bf16.msra.mxu1 %v4483_v7  ;;  %2412 = vmatprep.subr.bf16.mxu0 %v4488_v8  ;;  %v4546_v7 = vld [vmem:[#allocation5 + $0x1d0] ss:$28 sps:$4 sm:$0xff]  }
 0x10a   :  { %2582 = vmatprep.subr.bf16.mxu1 %v4491_v9  ;;  %v4551_v8 = vld [vmem:[#allocation5 + $0x20c] ss:$28 sps:$4 sm:$0xff]   ;;  %v4576_v9 = vld [vmem:[#allocation5 + $0xf8] ss:$28 sps:$4 sm:$0xff]  }
 0x10c   :  { %2413 = vmatpush1.bf16.msra.mxu0 %v4486_v10  ;;  %v4577_v10 = vld [vmem:[#allocation5 + $0x2f0] ss:$28 sps:$4 sm:$0xff]  }
 0x10d   :  { %2583 = vmatpush1.bf16.msra.mxu1 %v4489_v12  ;;  %2414 = vmatprep.subr.bf16.mxu0 %v4494_v14  ;;  %v4549_v12 = vld [vmem:[#allocation5 + $0x208] ss:$28 sps:$4 sm:$0xff]  }
 0x10e   :  { %2584 = vmatprep.subr.bf16.mxu1 %v4497_v15  ;;  %v4555_v14 = vld [vmem:[#allocation5 + $0x244] ss:$28 sps:$4 sm:$0xff]   ;;  %v4581_v15 = vld [vmem:[#allocation5 + $0x130] ss:$28 sps:$4 sm:$0xff]  }
 0x110   :  { %2415 = vmatpush1.bf16.msra.mxu0 %v4492_v16  ;;  %v4582_v16 = vld [vmem:[#allocation5 + $0x328] ss:$28 sps:$4 sm:$0xff]  }
 0x111   :  { %2585 = vmatpush1.bf16.msra.mxu1 %v4495_v17  ;;  %2416 = vmatprep.subr.bf16.mxu0 %v4500_v18  ;;  %v4553_v17 = vld [vmem:[#allocation5 + $0x240] ss:$28 sps:$4 sm:$0xff]  }
 0x112   :  { %2586 = vmatprep.subr.bf16.mxu1 %v4503_v19  ;;  %v4560_v18 = vld [vmem:[#allocation5 + $0x27c] ss:$28 sps:$4 sm:$0xff]   ;;  %v4586_v19 = vld [vmem:[#allocation5 + $0x168] ss:$28 sps:$4 sm:$0xff]  }
 0x114   :  { %2417 = vmatpush1.bf16.msra.mxu0 %v4498_v20  ;;  %v4587_v20 = vld [vmem:[#allocation5 + $0x360] ss:$28 sps:$4 sm:$0xff]  }
 0x115   :  { %2587 = vmatpush1.bf16.msra.mxu1 %v4501_v21  ;;  %2418 = vmatprep.subr.bf16.mxu0 %v4506_v22  ;;  %v4558_v21 = vld [vmem:[#allocation5 + $0x278] ss:$28 sps:$4 sm:$0xff]  }
 0x116   :  { %2588 = vmatprep.subr.bf16.mxu1 %v4509_v24  ;;  %v4565_v22 = vld [vmem:[#allocation5 + $0x2b4] ss:$28 sps:$4 sm:$0xff]   ;;  %v4591_v24 = vld [vmem:[#allocation5 + $0x1a0] ss:$28 sps:$4 sm:$0xff]  }
 0x118   :  { %2419 = vmatpush1.bf16.msra.mxu0 %v4504_v25  ;;  %v4592_v25 = vld [vmem:[#allocation5 + $0x558] ss:$28 sps:$4 sm:$0xff]  }
 0x119   :  { %2589 = vmatpush1.bf16.msra.mxu1 %v4507_v26  ;;  %2420 = vmatprep.subr.bf16.mxu0 %v4512_v27  ;;  %v4563_v26 = vld [vmem:[#allocation5 + $0x2b0] ss:$28 sps:$4 sm:$0xff]  }
 0x11a   :  { %2590 = vmatprep.subr.bf16.mxu1 %v4515_v29  ;;  %v4570_v27 = vld [vmem:[#allocation5 + $0x2ec] ss:$28 sps:$4 sm:$0xff]  }
 0x11b   :  { %v4597_v29 = vld [vmem:[#allocation5 + $0x590] ss:$28 sps:$4 sm:$0xff]  }
 0x11c   :  { %2421 = vmatpush1.bf16.msra.mxu0 %v4510_v28  ;;  %v4596_v28 = vld [vmem:[#allocation5 + $0x398] ss:$28 sps:$4 sm:$0xff]  }
 0x11d   :  { %2591 = vmatpush1.bf16.msra.mxu1 %v4513_v30  ;;  %2648 = vmatprep.subr.bf16.mxu0 %v4521_v34  ;;  %v4568_v30 = vld [vmem:[#allocation5 + $0x2e8] ss:$28 sps:$4 sm:$0xff]  }
 0x11e   :  { %2592 = vmatprep.subr.bf16.mxu1 %v4518_v35  ;;  %v4602_v34 = vld [vmem:[#allocation5 + $0x5c8] ss:$28 sps:$4 sm:$0xff]   ;;  %v4573_v35 = vld [vmem:[#allocation5 + $0x320] ss:$28 sps:$4 sm:$0xff]  }
 0x11f   :  { %2423 = vmatmul.mubr.bf16.vlgmr.msra.gmra.mrb[0].mxu0 %v5047_v36 }
 0x120   :  { %2649 = vmatpush1.bf16.msra.mxu0 %v4519_v38  ;;  %2680 = vmatprep.mubr.bf16.mxu0 %v5027_v54  ;;  %v4606_v38 = vld [vmem:[#allocation5 + $0x408] ss:$28 sps:$4 sm:$0xff]  }
 0x121   :  { %2593 = vmatpush1.bf16.msra.mxu1 %v4516_v37  ;;  %2650 = vmatprep.subr.bf16.mxu0 %v4524_v39  ;;  %v4580_v37 = vld [vmem:[#allocation5 + $0x35c] ss:$28 sps:$4 sm:$0xff]  }
 0x122   :  { %2605 = vmatprep.subr.bf16.mxu1 %v4530_v40  ;;  %v4607_v39 = vld [vmem:[#allocation5 + $0x600] ss:$28 sps:$4 sm:$0xff]   ;;  %v4578_v40 = vld [vmem:[#allocation5 + $0x358] ss:$28 sps:$4 sm:$0xff]  }
 0x124   :  { %2595 = vmatmul.mubr.bf16.vlgmr.msra.gmra.mrb[4].mxu1 %v5047_v36  ;;  %2651 = vmatpush1.bf16.msra.mxu0 %v4522_v41  ;;  %v4585_v41 = vld [vmem:[#allocation5 + $0x394] ss:$28 sps:$4 sm:$0xff]  }
 0x125   :  { %2652 = vmatprep.subr.bf16.mxu0 %v4527_v43  ;;  %2606 = vmatpush1.bf16.msra.mxu1 %v4528_v44  ;;  %v4611_v43 = vld [vmem:[#allocation5 + $0x440] ss:$28 sps:$4 sm:$0xff]   ;;  %v4612_v44 = vld [vmem:[#allocation5 + $0x638] ss:$28 sps:$4 sm:$0xff]  }
 0x126   :  { %2637 = vmatprep.mubr.bf16.mxu1 %v4926_v0  ;;  %4015 = vmatprep.subr.bf16.mxu1 %v4552_v45  ;;  %v4583_v45 = vld [vmem:[#allocation5 + $0x390] ss:$28 sps:$4 sm:$0xff]  }
 0x128   :  { %2653 = vmatpush1.bf16.msra.mxu0 %v4525_v46  ;;  %v4590_v46 = vld [vmem:[#allocation5 + $0x3cc] ss:$28 sps:$4 sm:$0xff]  }
 0x129   :  { %2654 = vmatprep.subr.bf16.mxu0 %v4533_v47  ;;  %v4616_v47 = vld [vmem:[#allocation5 + $0x478] ss:$28 sps:$4 sm:$0xff]  }
 0x12c   :  { %2655 = vmatpush1.bf16.msra.mxu0 %v4531_v48  ;;  %v4617_v48 = vld [vmem:[#allocation5 + $0x670] ss:$28 sps:$4 sm:$0xff]  }
 0x12d   :  { %2656 = vmatprep.subr.bf16.mxu0 %v4536_v49  ;;  %v4588_v49 = vld [vmem:[#allocation5 + $0x3c8] ss:$28 sps:$4 sm:$0xff]  }
 0x130   :  { %3961 = vmatmul.mubr.msk.bf16.vlgmr.msra.gmra.mrb[4].mxu1 %vm2300_vm0, %v5023_v11  ;;  %2657 = vmatpush1.bf16.msra.mxu0 %v4534_v50  ;;  %v4595_v50 = vld [vmem:[#allocation5 + $0x404] ss:$28 sps:$4 sm:$0xff]  }
 0x131   :  { %2658 = vmatprep.subr.bf16.mxu0 %v4539_v51  ;;  %4016 = vmatpush3.bf16.msra.mxu1 %v4556_v52  ;;  %v4621_v51 = vld [vmem:[#allocation5 + $0x4b0] ss:$28 sps:$4 sm:$0xff]   ;;  %v4622_v52 = vld [vmem:[#allocation5 + $0x6a8] ss:$28 sps:$4 sm:$0xff]  }
 0x132   :  { %4017 = vmatprep.subr.bf16.mxu1 %v4557_v53  ;;  %2852 = vmatprep.mubr.bf16.mxu1 %v5027_v54  ;;  %v4572_v54 = vld [vmem:[#allocation5 + $0x2b8] ss:$28 sps:$4 sm:$0xff]   ;;  %v4593_v53 = vld [vmem:[#allocation5 + $0x400] ss:$28 sps:$4 sm:$0xff]  }
 0x134   :  { %2659 = vmatpush1.bf16.msra.mxu0 %v4537_v55  ;;  %v4600_v55 = vld [vmem:[#allocation5 + $0x43c] ss:$28 sps:$4 sm:$0xff]  }
 0x135   :  { %2660 = vmatprep.subr.bf16.mxu0 %v4542_v56  ;;  %4018 = vmatpush3.bf16.msra.mxu1 %v4561_v57  ;;  %v4626_v56 = vld [vmem:[#allocation5 + $0x4e8] ss:$28 sps:$4 sm:$0xff]   ;;  %v4627_v57 = vld [vmem:[#allocation5 + $0x6e0] ss:$28 sps:$4 sm:$0xff]  }
 0x136   :  { %4019 = vmatprep.subr.bf16.mxu1 %v4562_v58  ;;  %v4598_v58 = vld [vmem:[#allocation5 + $0x438] ss:$28 sps:$4 sm:$0xff]  }
 0x137   :  { %v5056_v1 = vpop.f32.mrb[0].mxu1 }
 0x138   :  { %2661 = vmatpush1.bf16.msra.mxu0 %v4540_v59  ;;  %v5058_v4 = vpop.f32.mrb[1].mxu1  ;;  %v4631_v59 = vld [vmem:[#allocation5 + $0x520] ss:$28 sps:$4 sm:$0xff]  }
 0x139   :  { %2662 = vmatprep.subr.bf16.mxu0 %v4545_v60  ;;  %4020 = vmatpush3.bf16.msra.mxu1 %v4566_v61  ;;  %v5060_v5 = vpop.f32.mrb[2].mxu1  ;;  %v4603_v60 = vld [vmem:[#allocation5 + $0x470] ss:$28 sps:$4 sm:$0xff]  }
 0x13a   :  { %4021 = vmatprep.subr.bf16.mxu1 %v4567_v62  ;;  %v5062_v6 = vpop.f32.mrb[3].mxu1  ;;  %v4610_v61 = vld [vmem:[#allocation5 + $0x4ac] ss:$28 sps:$4 sm:$0xff]   ;;  %v4636_v62 = vld [vmem:[#allocation5 + $0x718] ss:$28 sps:$4 sm:$0xff]  }
 0x13c   :  { %2663 = vmatpush1.bf16.msra.mxu0 %v4543_v63  ;;  %v4637_v63 = vld [vmem:[#allocation5 + $0x910] ss:$28 sps:$4 sm:$0xff]  }
 0x13d   :  { %2664 = vmatprep.subr.bf16.mxu0 %v4548_v2  ;;  %4022 = vmatpush3.bf16.msra.mxu1 %v4571_v3  ;;  %v4608_v2 = vld [vmem:[#allocation5 + $0x4a8] ss:$28 sps:$4 sm:$0xff]  }
 0x13e   :  { %4023 = vmatprep.subr.bf16.mxu1 %v4572_v54  ;;  %v4615_v3 = vld [vmem:[#allocation5 + $0x4e4] ss:$28 sps:$4 sm:$0xff]   ;;  %v4641_v54 = vld [vmem:[#allocation5 + $0x750] ss:$28 sps:$4 sm:$0xff]  }
 0x140   :  { %2665 = vmatpush1.bf16.msra.mxu0 %v4546_v7  ;;  %v4613_v7 = vld [vmem:[#allocation5 + $0x4e0] ss:$28 sps:$4 sm:$0xff]  }
 0x141   :  { %2666 = vmatprep.subr.bf16.mxu0 %v4551_v8  ;;  %4024 = vmatpush3.bf16.msra.mxu1 %v4576_v9  ;;  %v4642_v8 = vld [vmem:[#allocation5 + $0x948] ss:$28 sps:$4 sm:$0xff]   ;;  %v4620_v9 = vld [vmem:[#allocation5 + $0x51c] ss:$28 sps:$4 sm:$0xff]  }
 0x142   :  { %4025 = vmatprep.subr.bf16.mxu1 %v4577_v10  ;;  %v4646_v10 = vld [vmem:[#allocation5 + $0x788] ss:$28 sps:$4 sm:$0xff]  }
 0x144   :  { %2667 = vmatpush1.bf16.msra.mxu0 %v4549_v12  ;;  %v4618_v12 = vld [vmem:[#allocation5 + $0x518] ss:$28 sps:$4 sm:$0xff]  }
 0x145   :  { %2668 = vmatprep.subr.bf16.mxu0 %v4555_v14  ;;  %4026 = vmatpush3.bf16.msra.mxu1 %v4581_v15  ;;  %v4647_v14 = vld [vmem:[#allocation5 + $0x980] ss:$28 sps:$4 sm:$0xff]   ;;  %v4625_v15 = vld [vmem:[#allocation5 + $0x554] ss:$28 sps:$4 sm:$0xff]  }
 0x146   :  { %4027 = vmatprep.subr.bf16.mxu1 %v4582_v16  ;;  %v4651_v16 = vld [vmem:[#allocation5 + $0x7c0] ss:$28 sps:$4 sm:$0xff]  }
 0x148   :  { %2669 = vmatpush1.bf16.msra.mxu0 %v4553_v17  ;;  %v4652_v17 = vld [vmem:[#allocation5 + $0x9b8] ss:$28 sps:$4 sm:$0xff]  }
 0x149   :  { %2670 = vmatprep.subr.bf16.mxu0 %v4560_v18  ;;  %4028 = vmatpush3.bf16.msra.mxu1 %v4586_v19  ;;  %v4623_v18 = vld [vmem:[#allocation5 + $0x550] ss:$28 sps:$4 sm:$0xff]  }
 0x14a   :  { %4029 = vmatprep.subr.bf16.mxu1 %v4587_v20  ;;  %v4630_v19 = vld [vmem:[#allocation5 + $0x58c] ss:$28 sps:$4 sm:$0xff]   ;;  %v4656_v20 = vld [vmem:[#allocation5 + $0x7f8] ss:$28 sps:$4 sm:$0xff]  }
 0x14c   :  { %2671 = vmatpush1.bf16.msra.mxu0 %v4558_v21  ;;  %v4657_v21 = vld [vmem:[#allocation5 + $0x9f0] ss:$28 sps:$4 sm:$0xff]  }
 0x14d   :  { %2672 = vmatprep.subr.bf16.mxu0 %v4565_v22  ;;  %4030 = vmatpush3.bf16.msra.mxu1 %v4591_v24  ;;  %v4628_v22 = vld [vmem:[#allocation5 + $0x588] ss:$28 sps:$4 sm:$0xff]  }
 0x14e   :  { %4037 = vmatprep.subr.bf16.mxu1 %v4592_v25  ;;  %v4635_v24 = vld [vmem:[#allocation5 + $0x5c4] ss:$28 sps:$4 sm:$0xff]   ;;  %v4661_v25 = vld [vmem:[#allocation5 + $0x830] ss:$28 sps:$4 sm:$0xff]  }
 0x150   :  { %2673 = vmatpush1.bf16.msra.mxu0 %v4563_v26  ;;  %2853 = vmatmul.mubr.bf16.vlgmr.msra.gmra.mrb[8].mxu1 %v5031_v13  ;;  %v4662_v26 = vld [vmem:[#allocation5 + $0xa28] ss:$28 sps:$4 sm:$0xff]  }
 0x151   :  { %2674 = vmatprep.subr.bf16.mxu0 %v4570_v27  ;;  %4038 = vmatpush3.bf16.msra.mxu1 %v4596_v28  ;;  %v4633_v27 = vld [vmem:[#allocation5 + $0x5c0] ss:$28 sps:$4 sm:$0xff]  }
 0x152   :  { %4039 = vmatprep.subr.bf16.mxu1 %v4597_v29  ;;  %2893 = vmatprep.mubr.bf16.mxu1 %v5035_v42  ;;  %v4640_v28 = vld [vmem:[#allocation5 + $0x5fc] ss:$28 sps:$4 sm:$0xff]   ;;  %v4666_v29 = vld [vmem:[#allocation5 + $0x868] ss:$28 sps:$4 sm:$0xff]  }
 0x154   :  { %2675 = vmatpush1.bf16.msra.mxu0 %v4568_v30  ;;  %v4667_v30 = vld [vmem:[#allocation5 + $0xa60] ss:$28 sps:$4 sm:$0xff]  }
 0x155   :  { %2676 = vmatprep.subr.bf16.mxu0 %v4575_v32  ;;  %4040 = vmatpush3.bf16.msra.mxu1 %v4601_v33  ;;  %v4638_v32 = vld [vmem:[#allocation5 + $0x5f8] ss:$28 sps:$4 sm:$0xff]  }
 0x156   :  { %4041 = vmatprep.subr.bf16.mxu1 %v4602_v34  ;;  %v4645_v33 = vld [vmem:[#allocation5 + $0x634] ss:$28 sps:$4 sm:$0xff]   ;;  %v4671_v34 = vld [vmem:[#allocation5 + $0x8a0] ss:$28 sps:$4 sm:$0xff]  }
 0x158   :  { %2677 = vmatpush1.bf16.msra.mxu0 %v4573_v35  ;;  %v4643_v35 = vld [vmem:[#allocation5 + $0x630] ss:$28 sps:$4 sm:$0xff]  }
 0x159   :  { %2678 = vmatprep.subr.bf16.mxu0 %v4580_v37  ;;  %4042 = vmatpush3.bf16.msra.mxu1 %v4606_v38  ;;  %v4650_v37 = vld [vmem:[#allocation5 + $0x66c] ss:$28 sps:$4 sm:$0xff]   ;;  %v4678_v38 = vld [vmem:[#allocation5 + $0xa98] ss:$28 sps:$4 sm:$0xff]  }
 0x15a   :  { %4043 = vmatprep.subr.bf16.mxu1 %v4607_v39  ;;  %v4927_v39 = vmov 0.0  }
 0x15c   :  { %2679 = vmatpush1.bf16.msra.mxu0 %v4578_v40  ;;  %v4715_v40 = vld [vmem:[#allocation8 + $0x40] sm:$0xff]  }
 0x15d   :  { %2691 = vmatprep.subr.bf16.mxu0 %v4585_v41  ;;  %4044 = vmatpush3.bf16.msra.mxu1 %v4611_v43  ;;  %v4648_v41 = vld [vmem:[#allocation5 + $0x668] ss:$28 sps:$4 sm:$0xff]  }
 0x15e   :  { %4045 = vmatprep.subr.bf16.mxu1 %v4612_v44  ;;  %v4655_v43 = vld [vmem:[#allocation5 + $0x6a4] ss:$28 sps:$4 sm:$0xff]  }
 0x15f   :  { %2681 = vmatmul.mubr.bf16.vlgmr.msra.gmra.mrb[4].mxu0 %v5031_v13  ;;  %v4605_v13 = vld [vmem:[#allocation5 + $0x474] ss:$28 sps:$4 sm:$0xff]   ;;  %v4653_v44 = vld [vmem:[#allocation5 + $0x6a0] ss:$28 sps:$4 sm:$0xff]  }
 0x160   :  { %2692 = vmatpush1.bf16.msra.mxu0 %v4583_v45  ;;  %2723 = vmatprep.mubr.bf16.mxu0 %v5035_v42  ;;  %v4632_v42 = vld [vmem:[#allocation5 + $0x8d8] ss:$28 sps:$4 sm:$0xff]  }
 0x161   :  { %2693 = vmatprep.subr.bf16.mxu0 %v4590_v46  ;;  %4046 = vmatpush3.bf16.msra.mxu1 %v4616_v47  ;;  %v4660_v45 = vld [vmem:[#allocation5 + $0x6dc] ss:$28 sps:$4 sm:$0xff]   ;;  %v4719_v46 = vld [vmem:[#allocation8] sm:$0xff]   ;;  %v4720_v47 = vld [vmem:[#allocation8 + $0x48] sm:$0xff]  }
 0x162   :  { %4047 = vmatprep.subr.bf16.mxu1 %v4617_v48  ;;  %v4658_v48 = vld [vmem:[#allocation5 + $0x6d8] ss:$28 sps:$4 sm:$0xff]  }
 0x164   :  { %2694 = vmatpush1.bf16.msra.mxu0 %v4588_v49  ;;  %v4665_v49 = vld [vmem:[#allocation5 + $0x714] ss:$28 sps:$4 sm:$0xff]  }
 0x165   :  { %2695 = vmatprep.subr.bf16.mxu0 %v4595_v50  ;;  %4048 = vmatpush3.bf16.msra.mxu1 %v4621_v51  ;;  %v4721_v50 = vld [vmem:[#allocation8 + $0x8] sm:$0xff]   ;;  %v4722_v51 = vld [vmem:[#allocation8 + $0x50] sm:$0xff]  }
 0x166   :  { %4049 = vmatprep.subr.bf16.mxu1 %v4622_v52  ;;  %v4663_v52 = vld [vmem:[#allocation5 + $0x710] ss:$28 sps:$4 sm:$0xff]  }
 0x168   :  { %2696 = vmatpush1.bf16.msra.mxu0 %v4593_v53  ;;  %v4670_v53 = vld [vmem:[#allocation5 + $0x74c] ss:$28 sps:$4 sm:$0xff]  }
 0x169   :  { %2697 = vmatprep.subr.bf16.mxu0 %v4600_v55  ;;  %4050 = vmatpush3.bf16.msra.mxu1 %v4626_v56  ;;  %v4723_v55 = vld [vmem:[#allocation8 + $0x10] sm:$0xff]   ;;  %v4724_v56 = vld [vmem:[#allocation8 + $0x58] sm:$0xff]  }
 0x16a   :  { %4051 = vmatprep.subr.bf16.mxu1 %v4627_v57  ;;  %v4668_v57 = vld [vmem:[#allocation5 + $0x748] ss:$28 sps:$4 sm:$0xff]  }
 0x16c   :  { %2698 = vmatpush1.bf16.msra.mxu0 %v4598_v58  ;;  %v4674_v58 = vld [vmem:[#allocation5 + $0x784] ss:$28 sps:$4 sm:$0xff]  }
 0x16d   :  { %2699 = vmatprep.subr.bf16.mxu0 %v4605_v13  ;;  %4052 = vmatpush3.bf16.msra.mxu1 %v4631_v59  ;;  %v4725_v13 = vld [vmem:[#allocation8 + $0x18] sm:$0xff]   ;;  %v4726_v59 = vld [vmem:[#allocation8 + $0x60] sm:$0xff]  }
 0x16e   :  { %4059 = vmatprep.subr.bf16.mxu1 %v4632_v42  ;;  %v4672_v42 = vld [vmem:[#allocation5 + $0x780] ss:$28 sps:$4 sm:$0xff]  }
 0x170   :  { %2700 = vmatpush1.bf16.msra.mxu0 %v4603_v60  ;;  %2894 = vmatmul.mubr.bf16.vlgmr.msra.gmra.mrb[12].mxu1 %v5039_v23  ;;  %v4677_v60 = vld [vmem:[#allocation5 + $0x7bc] ss:$28 sps:$4 sm:$0xff]  }
 0x171   :  { %2701 = vmatprep.subr.bf16.mxu0 %v4610_v61  ;;  %4060 = vmatpush3.bf16.msra.mxu1 %v4636_v62  ;;  %v4727_v61 = vld [vmem:[#allocation8 + $0x20] sm:$0xff]   ;;  %v4728_v62 = vld [vmem:[#allocation8 + $0x68] sm:$0xff]  }
 0x172   :  { %4061 = vmatprep.subr.bf16.mxu1 %v4637_v63  ;;  %2934 = vmatprep.mubr.bf16.mxu1 %v5042_v31  ;;  %v4681_v63 = vld [vmem:[#allocation5 + $0x7f4] ss:$28 sps:$4 sm:$0xff]  }
 0x174   :  { %2702 = vmatpush1.bf16.msra.mxu0 %v4608_v2  ;;  %v4730_v2 = vld [vmem:[#allocation8 + $0x70] sm:$0xff]  }
 0x175   :  { %2703 = vmatprep.subr.bf16.mxu0 %v4615_v3  ;;  %4062 = vmatpush3.bf16.msra.mxu1 %v4641_v54  ;;  %v4679_v3 = vld [vmem:[#allocation5 + $0x7f0] ss:$28 sps:$4 sm:$0xff]  }
 0x176   :  { %4063 = vmatprep.subr.bf16.mxu1 %v4642_v8  ;;  %v4684_v54 = vld [vmem:[#allocation5 + $0x82c] ss:$28 sps:$4 sm:$0xff]   ;;  %v4732_v8 = vld [vmem:[#allocation8 + $0x78] sm:$0xff]  }
 0x178   :  { %2704 = vmatpush1.bf16.msra.mxu0 %v4613_v7  ;;  %v4731_v7 = vld [vmem:[#allocation8 + $0x30] sm:$0xff]  }
 0x179   :  { %2705 = vmatprep.subr.bf16.mxu0 %v4620_v9  ;;  %4064 = vmatpush3.bf16.msra.mxu1 %v4646_v10  ;;  %v4682_v9 = vld [vmem:[#allocation5 + $0x828] ss:$28 sps:$4 sm:$0xff]  }
 0x17a   :  { %4065 = vmatprep.subr.bf16.mxu1 %v4647_v14  ;;  %v4687_v10 = vld [vmem:[#allocation5 + $0x864] ss:$28 sps:$4 sm:$0xff]  }
 0x17b   :  { %v4734_v14 = vld [vmem:[#allocation8 + $0xc0] sm:$0xff]  }
 0x17c   :  { %2706 = vmatpush1.bf16.msra.mxu0 %v4618_v12  ;;  %v4733_v12 = vld [vmem:[#allocation8 + $0x38] sm:$0xff]  }
 0x17d   :  { %2707 = vmatprep.subr.bf16.mxu0 %v4625_v15  ;;  %4066 = vmatpush3.bf16.msra.mxu1 %v4651_v16  ;;  %v4685_v15 = vld [vmem:[#allocation5 + $0x860] ss:$28 sps:$4 sm:$0xff]  }
 0x17e   :  { %4067 = vmatprep.subr.bf16.mxu1 %v4652_v17  ;;  %v4690_v16 = vld [vmem:[#allocation5 + $0x89c] ss:$28 sps:$4 sm:$0xff]  }
 0x17f   :  { %v4688_v17 = vld [vmem:[#allocation5 + $0x898] ss:$28 sps:$4 sm:$0xff]  }
 0x180   :  { %2708 = vmatpush1.bf16.msra.mxu0 %v4623_v18  ;;  %v4693_v18 = vld [vmem:[#allocation5 + $0x8d4] ss:$28 sps:$4 sm:$0xff]  }
 0x181   :  { %2709 = vmatprep.subr.bf16.mxu0 %v4630_v19  ;;  %4068 = vmatpush3.bf16.msra.mxu1 %v4656_v20  ;;  %v4691_v19 = vld [vmem:[#allocation5 + $0x8d0] ss:$28 sps:$4 sm:$0xff]  }
 0x182   :  { %4069 = vmatprep.subr.bf16.mxu1 %v4657_v21  ;;  %v4696_v20 = vld [vmem:[#allocation5 + $0x90c] ss:$28 sps:$4 sm:$0xff]  }
 0x183   :  { %v4694_v21 = vld [vmem:[#allocation5 + $0x908] ss:$28 sps:$4 sm:$0xff]  }
 0x184   :  { %2710 = vmatpush1.bf16.msra.mxu0 %v4628_v22  ;;  %v4699_v22 = vld [vmem:[#allocation5 + $0x944] ss:$28 sps:$4 sm:$0xff]  }
 0x185   :  { %2711 = vmatprep.subr.bf16.mxu0 %v4635_v24  ;;  %4070 = vmatpush3.bf16.msra.mxu1 %v4661_v25  ;;  %v4697_v24 = vld [vmem:[#allocation5 + $0x940] ss:$28 sps:$4 sm:$0xff]  }
 0x186   :  { %4071 = vmatprep.subr.bf16.mxu1 %v4662_v26  ;;  %v4702_v25 = vld [vmem:[#allocation5 + $0x97c] ss:$28 sps:$4 sm:$0xff]  }
 0x187   :  { %v4700_v26 = vld [vmem:[#allocation5 + $0x978] ss:$28 sps:$4 sm:$0xff]  }
 0x188   :  { %2712 = vmatpush1.bf16.msra.mxu0 %v4633_v27  ;;  %v4705_v27 = vld [vmem:[#allocation5 + $0x9b4] ss:$28 sps:$4 sm:$0xff]  }
 0x189   :  { %2713 = vmatprep.subr.bf16.mxu0 %v4640_v28  ;;  %4072 = vmatpush3.bf16.msra.mxu1 %v4666_v29  ;;  %v4703_v28 = vld [vmem:[#allocation5 + $0x9b0] ss:$28 sps:$4 sm:$0xff]  }
 0x18a   :  { %4073 = vmatprep.subr.bf16.mxu1 %v4667_v30  ;;  %v4708_v29 = vld [vmem:[#allocation5 + $0x9ec] ss:$28 sps:$4 sm:$0xff]  }
 0x18b   :  { %v4706_v30 = vld [vmem:[#allocation5 + $0x9e8] ss:$28 sps:$4 sm:$0xff]  }
 0x18c   :  { %2714 = vmatpush1.bf16.msra.mxu0 %v4638_v32  ;;  %v4711_v32 = vld [vmem:[#allocation5 + $0xa24] ss:$28 sps:$4 sm:$0xff]  }
 0x18d   :  { %2715 = vmatprep.subr.bf16.mxu0 %v4645_v33  ;;  %4074 = vmatpush3.bf16.msra.mxu1 %v4671_v34  ;;  %v4709_v33 = vld [vmem:[#allocation5 + $0xa20] ss:$28 sps:$4 sm:$0xff]  }
 0x18e   :  { %4151 = vmatprep.subr.bf16.mxu1 %v4927_v39  ;;  %v4714_v34 = vld [vmem:[#allocation5 + $0xa5c] ss:$28 sps:$4 sm:$0xff]  }
 0x190   :  { %2716 = vmatpush1.bf16.msra.mxu0 %v4643_v35  ;;  %2935 = vmatmul.mubr.bf16.vlgmr.msra.gmra.mrb[16].mxu1 %v5047_v36  ;;  %v4712_v35 = vld [vmem:[#allocation5 + $0xa58] ss:$28 sps:$4 sm:$0xff]  }
 0x191   :  { %2717 = vmatprep.subr.bf16.mxu0 %v4650_v37  ;;  %4152 = vmatpush3.bf16.msra.mxu1 %v4678_v38  ;;  %v4718_v37 = vld [vmem:[#allocation5 + $0xa94] ss:$28 sps:$4 sm:$0xff]  }
 0x192   :  { %4153 = vmatprep.mubr.msk.bf16.mxu1 %vm4928_vm1, %v4927_v39  ;;  %4083 = vmatprep.subr.bf16.mxu1 %v4715_v40  ;;  %v4716_v38 = vld [vmem:[#allocation5 + $0xa90] ss:$28 sps:$4 sm:$0xff]   ;;  %v501_v40 = vlaneseq }
 0x194   :  { %2718 = vmatpush1.bf16.msra.mxu0 %v4648_v41  ;;  %v5082_v41 = vshrl.u32 %v501_v40, 7 }
 0x195   :  { %2719 = vmatprep.subr.bf16.mxu0 %v4655_v43 }
 0x196   :  { %v503_v43 = vsub.s32 0, %v5082_v41 }
 0x198   :  { %2720 = vmatpush1.bf16.msra.mxu0 %v4653_v44  ;;  %4154 = vmatmul.mubr.msk.bf16.vlgmr.msra.gmra.mrb[20].mxu1 %vm2300_vm0, %v5023_v11  ;;  %v5087_v44 = vld [vmem:[#allocation7] sm:$0x7f] }
 0x199   :  { %2721 = vmatprep.subr.bf16.mxu0 %v4660_v45  ;;  %4084 = vmatpush3.bf16.msra.mxu1 %v4719_v46  ;;  %v507_v45 = vsub.s32 1, %v5082_v41 }
 0x19a   :  { %4085 = vmatprep.subr.bf16.mxu1 %v4720_v47  ;;  %v4750_v47 = vld [vmem:[#allocation8 + $0x180] sm:$0xff]  }
 0x19c   :  { %2722 = vmatpush1.bf16.msra.mxu0 %v4658_v48 }
 0x19d   :  { %2734 = vmatprep.subr.bf16.mxu0 %v4665_v49  ;;  %4086 = vmatpush3.bf16.msra.mxu1 %v4721_v50 }
 0x19e   :  { %4087 = vmatprep.subr.bf16.mxu1 %v4722_v51 }
 0x19f   :  { %2724 = vmatmul.mubr.bf16.vlgmr.msra.gmra.mrb[4].mxu0 %v5039_v23  ;;  %v4675_v23 = vld [vmem:[#allocation5 + $0x7b8] ss:$28 sps:$4 sm:$0xff]  }
 0x1a0   :  { %2735 = vmatpush1.bf16.msra.mxu0 %v4663_v52  ;;  %2766 = vmatprep.mubr.bf16.mxu0 %v5042_v31  ;;  %v4729_v31 = vld [vmem:[#allocation8 + $0x28] sm:$0xff]  }
 0x1a1   :  { %2736 = vmatprep.subr.bf16.mxu0 %v4670_v53  ;;  %4088 = vmatpush3.bf16.msra.mxu1 %v4723_v55 }
 0x1a2   :  { %4089 = vmatprep.subr.bf16.mxu1 %v4724_v56 }
 0x1a4   :  { %2737 = vmatpush1.bf16.msra.mxu0 %v4668_v57 }
 0x1a5   :  { %2738 = vmatprep.subr.bf16.mxu0 %v4674_v58  ;;  %4090 = vmatpush3.bf16.msra.mxu1 %v4725_v13 }
 0x1a6   :  { %4091 = vmatprep.subr.bf16.mxu1 %v4726_v59 }
 0x1a8   :  { %2739 = vmatpush1.bf16.msra.mxu0 %v4672_v42 }
 0x1a9   :  { %2740 = vmatprep.subr.bf16.mxu0 %v4677_v60  ;;  %4092 = vmatpush3.bf16.msra.mxu1 %v4727_v61 }
 0x1aa   :  { %4093 = vmatprep.subr.bf16.mxu1 %v4728_v62  ;;  %v4735_v62 = vld [vmem:[#allocation8 + $0x80] sm:$0xff]  }
 0x1ac   :  { %2741 = vmatpush1.bf16.msra.mxu0 %v4675_v23  ;;  %v511_v23 = vsub.s32 2, %v5082_v41 }
 0x1ad   :  { %2742 = vmatprep.subr.bf16.mxu0 %v4681_v63  ;;  %4094 = vmatpush3.bf16.msra.mxu1 %v4729_v31  ;;  %v4736_v63 = vld [vmem:[#allocation8 + $0xc8] sm:$0xff]   ;;  %v4738_v31 = vld [vmem:[#allocation8 + $0xd0] sm:$0xff]  }
 0x1ae   :  { %4095 = vmatprep.subr.bf16.mxu1 %v4730_v2 }
 0x1b0   :  { %2743 = vmatpush1.bf16.msra.mxu0 %v4679_v3 }
 0x1b1   :  { %2744 = vmatprep.subr.bf16.mxu0 %v4684_v54  ;;  %4096 = vmatpush3.bf16.msra.mxu1 %v4731_v7  ;;  %v4739_v7 = vld [vmem:[#allocation8 + $0x90] sm:$0xff]  }
 0x1b2   :  { %4097 = vmatprep.subr.bf16.mxu1 %v4732_v8 }
 0x1b4   :  { %2745 = vmatpush1.bf16.msra.mxu0 %v4682_v9 }
 0x1b5   :  { %2746 = vmatprep.subr.bf16.mxu0 %v4687_v10  ;;  %4098 = vmatpush3.bf16.msra.mxu1 %v4733_v12  ;;  %v4740_v10 = vld [vmem:[#allocation8 + $0xd8] sm:$0xff]  }
 0x1b6   :  { %4105 = vmatprep.subr.bf16.mxu1 %v4734_v14 }
 0x1b8   :  { %2747 = vmatpush1.bf16.msra.mxu0 %v4685_v15 }
 0x1b9   :  { %2748 = vmatprep.subr.bf16.mxu0 %v4690_v16 }
 0x1bc   :  { %2749 = vmatpush1.bf16.msra.mxu0 %v4688_v17 }
 0x1bd   :  { %2750 = vmatprep.subr.bf16.mxu0 %v4693_v18  ;;  %v4741_v18 = vld [vmem:[#allocation8 + $0x98] sm:$0xff]  }
 0x1c0   :  { %2751 = vmatpush1.bf16.msra.mxu0 %v4691_v19 }
 0x1c1   :  { %2752 = vmatprep.subr.bf16.mxu0 %v4696_v20 }
 0x1c4   :  { %2753 = vmatpush1.bf16.msra.mxu0 %v4694_v21  ;;  %v4742_v21 = vld [vmem:[#allocation8 + $0xe0] sm:$0xff]  }
 0x1c5   :  { %2754 = vmatprep.subr.bf16.mxu0 %v4699_v22 }
 0x1c8   :  { %2755 = vmatpush1.bf16.msra.mxu0 %v4697_v24 }
 0x1c9   :  { %2756 = vmatprep.subr.bf16.mxu0 %v4702_v25  ;;  %v4743_v25 = vld [vmem:[#allocation8 + $0xa0] sm:$0xff]  }
 0x1cc   :  { %2757 = vmatpush1.bf16.msra.mxu0 %v4700_v26  ;;  %v4744_v26 = vld [vmem:[#allocation8 + $0xe8] sm:$0xff]  }
 0x1cd   :  { %2758 = vmatprep.subr.bf16.mxu0 %v4705_v27  ;;  %v4745_v27 = vld [vmem:[#allocation8 + $0xa8] sm:$0xff]  }
 0x1d0   :  { %2759 = vmatpush1.bf16.msra.mxu0 %v4703_v28  ;;  %v4746_v28 = vld [vmem:[#allocation8 + $0xf0] sm:$0xff]  }
 0x1d1   :  { %2760 = vmatprep.subr.bf16.mxu0 %v4708_v29  ;;  %v4747_v29 = vld [vmem:[#allocation8 + $0xb0] sm:$0xff]  }
 0x1d4   :  { %2761 = vmatpush1.bf16.msra.mxu0 %v4706_v30  ;;  %v4748_v30 = vld [vmem:[#allocation8 + $0xf8] sm:$0xff]  }
 0x1d5   :  { %2762 = vmatprep.subr.bf16.mxu0 %v4711_v32  ;;  %v4749_v32 = vld [vmem:[#allocation8 + $0xb8] sm:$0xff]  }
 0x1d8   :  { %2763 = vmatpush1.bf16.msra.mxu0 %v4709_v33  ;;  %v4751_v33 = vld [vmem:[#allocation8 + $0x140] sm:$0xff]  }
 0x1d9   :  { %2764 = vmatprep.subr.bf16.mxu0 %v4714_v34  ;;  %v4752_v34 = vld [vmem:[#allocation8 + $0x100] sm:$0xff]  }
 0x1dc   :  { %2765 = vmatpush1.bf16.msra.mxu0 %v4712_v35  ;;  %v4753_v35 = vld [vmem:[#allocation8 + $0x148] sm:$0xff]  }
 0x1dd   :  { %2777 = vmatprep.subr.bf16.mxu0 %v4718_v37  ;;  %v4754_v37 = vld [vmem:[#allocation8 + $0x108] sm:$0xff]  }
 0x1df   :  { %2767 = vmatmul.mubr.bf16.vlgmr.msra.gmra.mrb[4].mxu0 %v5047_v36  ;;  %v508_v36 = vrot.slane %v5087_v44, %v507_v45 }
 0x1e0   :  { %2778 = vmatpush1.bf16.msra.mxu0 %v4716_v38  ;;  %2809 = vmatprep.mubr.bf16.mxu0 %v4926_v0  ;;  %v504_v0 = vrot.slane %v5087_v44, %v503_v43  ;;  %v4755_v38 = vld [vmem:[#allocation8 + $0x150] sm:$0xff]  }
 0x1e1   :  { %4157 = vmatprep.subr.bf16.mxu0 %v4927_v39 }
 0x1eb   :  { %3962 = vmatmul.mubr.msk.bf16.vlgmr.msra.gmra.mrb[4].mxu0 %vm2300_vm0, %v5023_v11 }
 0x1ec   :  { %4159 = vmatprep.mubr.msk.bf16.mxu0 %vm4928_vm1, %v4927_v39  ;;  %4158 = vmatpush3.bf16.msra.mxu0 %v4750_v47  ;;  %v4757_v47 = vld [vmem:[#allocation8 + $0x158] sm:$0xff]  }
 0x1f2   :  { %v2424_v46 = vpop.f32.mrb[0].mxu0 }
 0x1f3   :  { %v4163_v48 = vadd.f32 %v2424_v46, %v504_v0  ;;  %v2426_v49 = vpop.f32.mrb[1].mxu0 }
 0x1f4   :  { %v4165_v50 = vadd.f32 %v2426_v49, %v508_v36  ;;  %v2428_v51 = vpop.f32.mrb[2].mxu0 }
 0x1f5   :  { %v4164_v11 = vadd.f32 %v4163_v48, %v5056_v1  ;;  %v4167_v52 = vadd.f32 %v2428_v51, %v504_v0  ;;  %v2430_v53 = vpop.f32.mrb[3].mxu0  ;;  %v515_v1 = vsub.s32 3, %v5082_v41  ;;  %v4756_v0 = vld [vmem:[#allocation8 + $0x110] sm:$0xff]   ;;  %v4759_v51 = vld [vmem:[#allocation8 + $0x160] sm:$0xff]  }
 0x1f6   :  { %v4166_v55 = vadd.f32 %v4165_v50, %v5058_v4  ;;  %v4169_v56 = vadd.f32 %v2430_v53, %v508_v36  ;;  %v512_v4 = vrot.slane %v5087_v44, %v511_v23  ;;  %v4758_v50 = vld [vmem:[#allocation8 + $0x118] sm:$0xff]   ;;  %v527_v53 = vsub.s32 6, %v5082_v41 }
 0x1f7   :  { %v4168_v39 = vadd.f32 %v4167_v52, %v5060_v5  ;;  %v2984_v58 = vmax.f32 %v4164_v11, 0.0  ;;  %v4737_v5 = vld [vmem:[#allocation8 + $0x88] sm:$0xff]   ;;  %v4760_v11 = vld [vmem:[#allocation8 + $0x120] sm:$0xff]   ;;  %v4766_v23 = vld [vmem:[#allocation8 + $0x138] sm:$0xff]  }
 0x1f8   :  { %v4170_v57 = vadd.f32 %v4169_v56, %v5062_v6  ;;  %v2985_v59 = vmax.f32 %v4166_v55, 0.0  ;;  %v516_v6 = vrot.slane %v5087_v44, %v515_v1  ;;  %v4761_v52 = vld [vmem:[#allocation8 + $0x168] sm:$0xff]   ;;  %v528_v56 = vrot.slane %v5087_v44, %v527_v53 }
 0x1f9   :  { %v2991_v13 = vmax.f32 %v4168_v39, 0.0  ;;  %v4762_v55 = vld [vmem:[#allocation8 + $0x128] sm:$0xff]   ;;  %v4763_v39 = vld [vmem:[#allocation8 + $0x170] sm:$0xff]  }
 0x1fa   :  { %v2992_v42 = vmax.f32 %v4170_v57, 0.0  ;;  %v4764_v57 = vld [vmem:[#allocation8 + $0x130] sm:$0xff]  }
 0x1fb   :  { %v2998_v60 = vpack.c.bf16 %v2991_v13, %v2984_v58 }
 0x1fc   :  { %v2999_v61 = vpack.c.bf16 %v2992_v42, %v2985_v59  ;;  %v4765_v42 = vld [vmem:[#allocation8 + $0x178] sm:$0xff]  }
 0x1fe   :  { %3439 = vmatprep.mubr.bf16.mxu1 %v2999_v61 }
 0x1ff   :  { %3440 = vmatmul.mubr.bf16.vlgmr.msra.gmra.mrb[24].mxu1 %v2998_v60 }
 0x200   :  { %4106 = vmatpush3.bf16.msra.mxu1 %v4735_v62 }
 0x201   :  { %4107 = vmatprep.subr.bf16.mxu1 %v4736_v63 }
 0x203   :  { %v2639_v2 = vpop.f32.mrb[4].mxu1 }
 0x204   :  { %v4171_v3 = vadd.f32 %v2639_v2, %v512_v4  ;;  %v2641_v54 = vpop.f32.mrb[5].mxu1  ;;  %4108 = vmatpush3.bf16.msra.mxu1 %v4737_v5 }
 0x205   :  { %v4172_v8 = vadd.f32 %v2641_v54, %v516_v6  ;;  %v2643_v9 = vpop.f32.mrb[6].mxu1  ;;  %4109 = vmatprep.subr.bf16.mxu1 %v4738_v31 }
 0x206   :  { %v4173_v12 = vadd.f32 %v2643_v9, %v512_v4  ;;  %v2645_v14 = vpop.f32.mrb[7].mxu1  ;;  %v2986_v16 = vmax.f32 %v4171_v3, 0.0 }
 0x207   :  { %v4174_v15 = vadd.f32 %v2645_v14, %v516_v6  ;;  %v2987_v19 = vmax.f32 %v4172_v8, 0.0 }
 0x208   :  { %v2993_v17 = vmax.f32 %v4173_v12, 0.0  ;;  %4110 = vmatpush3.bf16.msra.mxu1 %v4739_v7 }
 0x209   :  { %v2994_v20 = vmax.f32 %v4174_v15, 0.0  ;;  %4111 = vmatprep.subr.bf16.mxu1 %v4740_v10 }
 0x20a   :  { %v3000_v22 = vpack.c.bf16 %v2993_v17, %v2986_v16 }
 0x20b   :  { %v3001_v24 = vpack.c.bf16 %v2994_v20, %v2987_v19 }
 0x20c   :  { %4112 = vmatpush3.bf16.msra.mxu1 %v4741_v18 }
 0x20d   :  { %3480 = vmatprep.mubr.bf16.mxu1 %v3001_v24  ;;  %4113 = vmatprep.subr.bf16.mxu1 %v4742_v21  ;;  %v519_v21 = vsub.s32 4, %v5082_v41 }
 0x20f   :  { %v520_v24 = vrot.slane %v5087_v44, %v519_v21 }
 0x210   :  { %4114 = vmatpush3.bf16.msra.mxu1 %v4743_v25 }
 0x211   :  { %4115 = vmatprep.subr.bf16.mxu1 %v4744_v26 }
 0x214   :  { %4116 = vmatpush3.bf16.msra.mxu1 %v4745_v27 }
 0x215   :  { %4117 = vmatprep.subr.bf16.mxu1 %v4746_v28 }
 0x218   :  { %4118 = vmatpush3.bf16.msra.mxu1 %v4747_v29 }
 0x219   :  { %4119 = vmatprep.subr.bf16.mxu1 %v4748_v30 }
 0x21c   :  { %4120 = vmatpush3.bf16.msra.mxu1 %v4749_v32 }
 0x21d   :  { %4127 = vmatprep.subr.bf16.mxu1 %v4751_v33 }
 0x21f   :  { %3481 = vmatmul.mubr.bf16.vlgmr.msra.gmra.mrb[28].mxu1 %v3000_v22  ;;  %v523_v22 = vsub.s32 5, %v5082_v41 }
 0x220   :  { %4128 = vmatpush3.bf16.msra.mxu1 %v4752_v34 }
 0x221   :  { %4129 = vmatprep.subr.bf16.mxu1 %v4753_v35  ;;  %v524_v25 = vrot.slane %v5087_v44, %v523_v22 }
 0x223   :  { %v4031_v43 = vpop.f32.mrb[8].mxu1 }
 0x224   :  { %v4032_v45 = vpop.f32.mrb[9].mxu1  ;;  %4130 = vmatpush3.bf16.msra.mxu1 %v4754_v37 }
 0x225   :  { %v4033_v36 = vadd.f32 %v4032_v45, %v4031_v43  ;;  %v4034_v46 = vpop.f32.mrb[10].mxu1  ;;  %4131 = vmatprep.subr.bf16.mxu1 %v4755_v38 }
 0x226   :  { %v4035_v48 = vpop.f32.mrb[11].mxu1 }
 0x227   :  { %v4036_v49 = vadd.f32 %v4035_v48, %v4034_v46  ;;  %v2855_v58 = vadd.f32 %v4033_v36, %v528_v56 }
 0x228   :  { %4132 = vmatpush3.bf16.msra.mxu1 %v4756_v0 }
 0x229   :  { %4133 = vmatprep.subr.bf16.mxu1 %v4757_v47  ;;  %v2858_v60 = vadd.f32 %v4036_v49, %v528_v56  ;;  %v3964_v49 = vld [vmem:[#allocation10] ss:$0 sm:$0xff] }
 0x22c   :  { %4134 = vmatpush3.bf16.msra.mxu1 %v4758_v50 }
 0x22d   :  { %4135 = vmatprep.subr.bf16.mxu1 %v4759_v51 }
 0x230   :  { %4136 = vmatpush3.bf16.msra.mxu1 %v4760_v11 }
 0x231   :  { %4137 = vmatprep.subr.bf16.mxu1 %v4761_v52 }
 0x234   :  { %4138 = vmatpush3.bf16.msra.mxu1 %v4762_v55 }
 0x235   :  { %4139 = vmatprep.subr.bf16.mxu1 %v4763_v39 }
 0x238   :  { %4140 = vmatpush3.bf16.msra.mxu1 %v4764_v57 }
 0x239   :  { %4141 = vmatprep.subr.bf16.mxu1 %v4765_v42 }
 0x23c   :  { %4142 = vmatpush3.bf16.msra.mxu1 %v4766_v23  ;;  %v3572_v23 = vand.u32 127, %v501_v40 }
 0x23e   :  { %vm3573_vm2 = vcmp.lt.s32.totalorder %v3572_v23, 10 }
 0x243   :  { %v4053_v13 = vpop.f32.mrb[12].mxu1 }
 0x244   :  { %v4054_v59 = vpop.f32.mrb[13].mxu1 }
 0x245   :  { %v4055_v61 = vadd.f32 %v4054_v59, %v4053_v13  ;;  %v4056_v62 = vpop.f32.mrb[14].mxu1 }
 0x246   :  { %v4057_v63 = vpop.f32.mrb[15].mxu1 }
 0x247   :  { %v2896_v1 = vadd.f32 %v4055_v61, %v2855_v58  ;;  %v4058_v4 = vadd.f32 %v4057_v63, %v4056_v62 }
 0x249   :  { %v2899_v5 = vadd.f32 %v4058_v4, %v2858_v60 }
 0x263   :  { %v4075_v6 = vpop.f32.mrb[16].mxu1 }
 0x264   :  { %v4076_v31 = vpop.f32.mrb[17].mxu1 }
 0x265   :  { %v4077_v2 = vadd.f32 %v4076_v31, %v4075_v6  ;;  %v4078_v3 = vpop.f32.mrb[18].mxu1 }
 0x266   :  { %v4079_v54 = vpop.f32.mrb[19].mxu1 }
 0x267   :  { %v4080_v7 = vadd.f32 %v4079_v54, %v4078_v3  ;;  %v2937_v8 = vadd.f32 %v4077_v2, %v2896_v1 }
 0x269   :  { %v2940_v9 = vadd.f32 %v4080_v7, %v2899_v5 }
 0x26b   :  { %v2977_v10 = vpop.f32.mrb[20].mxu1 }
 0x26c   :  { %v2978_v12 = vadd.f32 %v2977_v10, %v2937_v8  ;;  %v4155_v14 = vpop.f32.mrb[21].mxu1 }
 0x26d   :  { %v2980_v15 = vpop.f32.mrb[22].mxu1 }
 0x26e   :  { %v2990_v16 = vmax.f32 %v2978_v12, 0.0  ;;  %v2981_v17 = vadd.f32 %v2980_v15, %v2940_v9  ;;  %v4156_v18 = vpop.f32.mrb[23].mxu1 }
 0x270   :  { %v2997_v19 = vmax.f32 %v2981_v17, 0.0 }
 0x272   :  { %v3004_v20 = vpack.c.bf16 %v2997_v19, %v2990_v16 }
 0x274   :  { %4160 = vmatmul.mubr.msk.bf16.vlgmr.msra.gmra.mrb[8].mxu0 %vm2300_vm0, %v3004_v20 }
 0x2be   :  { %v2811_v26 = vpop.f32.mrb[4].mxu0 }
 0x2bf   :  { %v4175_v27 = vadd.f32 %v2811_v26, %v520_v24  ;;  %v2813_v28 = vpop.f32.mrb[5].mxu0 }
 0x2c0   :  { %v4176_v29 = vadd.f32 %v2813_v28, %v524_v25  ;;  %v2815_v30 = vpop.f32.mrb[6].mxu0 }
 0x2c1   :  { %v4177_v32 = vadd.f32 %v2815_v30, %v520_v24  ;;  %v2817_v33 = vpop.f32.mrb[7].mxu0  ;;  %v2988_v35 = vmax.f32 %v4175_v27, 0.0 }
 0x2c2   :  { %v4178_v34 = vadd.f32 %v2817_v33, %v524_v25  ;;  %v2989_v38 = vmax.f32 %v4176_v29, 0.0 }
 0x2c3   :  { %v2995_v37 = vmax.f32 %v4177_v32, 0.0 }
 0x2c4   :  { %v2996_v43 = vmax.f32 %v4178_v34, 0.0 }
 0x2c5   :  { %v3002_v45 = vpack.c.bf16 %v2995_v37, %v2988_v35 }
 0x2c6   :  { %v3003_v0 = vpack.c.bf16 %v2996_v43, %v2989_v38 }
 0x2c8   :  { %3521 = vmatprep.mubr.bf16.mxu1 %v3003_v0 }
 0x2c9   :  { %3522 = vmatmul.mubr.bf16.vlgmr.msra.gmra.mrb[32].mxu1 %v3002_v45 }
 0x2d2   :  { %v4099_v41 = vpop.f32.mrb[24].mxu1 }
 0x2d3   :  { %v4100_v36 = vpop.f32.mrb[25].mxu1 }
 0x2d4   :  { %v4101_v46 = vadd.f32 %v4100_v36, %v4099_v41  ;;  %v4102_v44 = vpop.f32.mrb[26].mxu1 }
 0x2d5   :  { %v4103_v47 = vpop.f32.mrb[27].mxu1 }
 0x2d6   :  { %v4104_v48 = vadd.f32 %v4103_v47, %v4102_v44  ;;  %v3442_v11 = vadd.f32 %v4101_v46, %v3964_v49 }
 0x2d8   :  { %v3445_v56 = vadd.f32 %v4104_v48, %v3964_v49 }
 0x2f2   :  { %v4121_v50 = vpop.f32.mrb[28].mxu1 }
 0x2f3   :  { %v4122_v51 = vpop.f32.mrb[29].mxu1 }
 0x2f4   :  { %v4123_v52 = vadd.f32 %v4122_v51, %v4121_v50  ;;  %v4124_v53 = vpop.f32.mrb[30].mxu1 }
 0x2f5   :  { %v4125_v55 = vpop.f32.mrb[31].mxu1 }
 0x2f6   :  { %v3483_v39 = vadd.f32 %v4123_v52, %v3442_v11  ;;  %v4126_v57 = vadd.f32 %v4125_v55, %v4124_v53 }
 0x2f8   :  { %v3486_v58 = vadd.f32 %v4126_v57, %v3445_v56 }
 0x347   :  { %v3564_v13 = vpop.f32.mrb[8].mxu0 }
 0x348   :  { %v4161_v59 = vpop.f32.mrb[9].mxu0 }
 0x349   :  { %v3567_v42 = vpop.f32.mrb[10].mxu0 }
 0x34a   :  { %v4162_v60 = vpop.f32.mrb[11].mxu0 }
 0x39c   :  { %v4143_v61 = vpop.f32.mrb[32].mxu1 }
 0x39d   :  { %v4144_v62 = vpop.f32.mrb[33].mxu1 }
 0x39e   :  { %v4145_v63 = vadd.f32 %v4144_v62, %v4143_v61  ;;  %v4146_v1 = vpop.f32.mrb[34].mxu1 }
 0x39f   :  { %v4147_v4 = vpop.f32.mrb[35].mxu1 }
 0x3a0   :  { %v3524_v5 = vadd.f32 %v4145_v63, %v3483_v39  ;;  %v4148_v6 = vadd.f32 %v4147_v4, %v4146_v1 }
 0x3a2   :  { %v3527_v31 = vadd.f32 %v4148_v6, %v3486_v58  ;;  %v3565_v2 = vadd.f32 %v3564_v13, %v3524_v5 }
 0x3a4   :  { %v3574_v3 = vsel %vm3573_vm2, %v3565_v2, -1e+30  ;;  %v3568_v54 = vadd.f32 %v3567_v42, %v3527_v31 }
 0x3a5   :  { %3576 = vmax.xlane.f32.xlu0 %v3574_v3 }
 0x3a6   :  { %v3575_v7 = vsel %vm3573_vm2, %v3568_v54, -1e+30 }
 0x3a9   :  { %3578 = vmax.xlane.f32.xlu0 %v3575_v7 }
 0x432   :  { %v3577_v8 = vpop.xlane.xlu0 %3576 }
 0x433   :  { %v3580_v9 = vsub.f32 %v3574_v3, %v3577_v8 }
 0x435   :  { %v3582_v10 = vmul.f32 1.442695, %v3580_v9 }
 0x436   :  { %v3579_v12 = vpop.xlane.xlu0 %3578 }
 0x437   :  { %v3581_v14 = vsub.f32 %v3575_v7, %v3579_v12  ;;  %4767 = vpow2.f32 %v3582_v10 }
 0x439   :  { %v3584_v40 = vmul.f32 1.442695, %v3581_v14 }
 0x43b   :  { %4769 = vpow2.f32 %v3584_v40 }
 0x441   :  { %v4768_v15 = vpop.eup %4767 }
 0x442   :  { %3586 = vadd.xlane.f32.xlu1 %v4768_v15 }
 0x445   :  { %v4770_v16 = vpop.eup %4769 }
 0x446   :  { %3588 = vadd.xlane.f32.xlu1 %v4770_v16 }
 0x4cf   :  { %v3587_v17 = vpop.xlane.xlu1 %3586 }
 0x4d0   :  { %4771 = vlog2.f32 %v3587_v17 }
 0x4d3   :  { %v3589_v18 = vpop.xlane.xlu1 %3588 }
 0x4d4   :  { %4773 = vlog2.f32 %v3589_v18 }
 0x4da   :  { %v4772_v19 = vpop.eup %4771 }
 0x4db   :  { %v3591_v20 = vmul.f32 0.6931472, %v4772_v19 }
 0x4dd   :  { %v3594_v21 = vsub.f32 %v3580_v9, %v3591_v20 }
 0x4de   :  { %v4774_v22 = vpop.eup %4773 }
 0x4df   :  { %3596 = vst [vmem:[#allocation11] sm:$0xff] %v3594_v21  ;;  %v3593_v24 = vmul.f32 0.6931472, %v4774_v22 }
 0x4e1   :  { %v3595_v25 = vsub.f32 %v3581_v14, %v3593_v24 }
 0x4e3   :  { %3597 = vst [vmem:[#allocation11 + $0x8] sm:$0xff] %v3595_v25 }
 0x4e4   :  { %4896 = shalt.err (!%p4893_p2)
}
 0x4e5   :  { %s4897_s9 = scalar_lea.hbm %s5127_s5, 256 }
 0x4e6   :  { %p4898_p3 = scmp.ne.s32.totalorder %s5127_s5, %s4897_s9  ;;  %p4901_p4 = scmp.lt.u32.totalorder %s4897_s9, %s5127_s5 }
 0x4e8   :  { %p4903_p5 = pnand %p4901_p4, %p4898_p3 }
 0x4ea   :  { %4906 = shalt.err (!%p4903_p5)
}
 0x4eb   :  { %s4930_s14 = smov 128   ;;  %s4931_s15 = smov 8  }
 0x4ec   :  { %3609 = dma.vmem_to_hbm [thread:$0]  %s3604_s30, 256, %s5127_s5, [#allocation4], %s4930_s14, %s4930_s14, %s4931_s15  }
 0x4ed   :  { %4913 = dma.done.wait [#allocation4], 256  }
 0x4ee   :  { %4914 = vsyncadd [#allocation4], 4294967040 }
 0x4ef   :  { %3613 = vsyncpa [#allocation3], 1 }
 0x4f0   :  { %3614 = vsyncpa [#allocation6], 1 }
 0x4f1   :  { %3615 = vsyncpa [#allocation9], 1 }
 0x4f2   :  { %3616 = vsyncpa [#allocation4], 1 }

</bundles_post_ra>
